<compile_context>
chip_gen: v7x
topology: tpu7x:2x2x1
jax: 0.10.0
libtpu: 0.0.40
codegen_flags: <defaults>
</compile_context>

<pallas_src>
import jax
import jax.numpy as jnp
from jax.experimental import pallas as pl
from jax.experimental.pallas import tpu as pltpu


def _round_up(x: int, m: int) -> int:
    return ((x + m - 1) // m) * m


def _default_num_core_splits() -> int:
    # Two TensorCores per chip only on v7x-class parts; v5e/v6e have one.
    try:
        kind = jax.devices()[0].device_kind.lower()
    except Exception:
        return 1
    return 2 if "v7" in kind else 1


def make_mpgnn_head_kernel(num_graphs_onehot: int):
    """num_graphs_onehot: one-hot rows = num_graphs rounded up to a sublane multiple."""
    G_oh = num_graphs_onehot

    def kernel(hb_ref, hT_ref, w_ref, b_ref, out_ref):
        c = pl.program_id(0)            # core split (parallel axis)
        i = pl.program_id(1)            # node tile within this split (reduction axis)

        @pl.when(i == 0)
        def _():
            out_ref[...] = jnp.zeros_like(out_ref)

        # Fused Linear: per-node score s_n = <w, h_n>   (MXU, M=1, K=H).
        # Leave this on the MXU even though utilization is tiny; it keeps the VALU free.
        hT = hT_ref[...]                                              # (H, TN) lane-dense
        s = jnp.dot(w_ref[...], hT,
                    preferred_element_type=jnp.float32)               # (1, TN) f32

        # Lane-dense one-hot: graphs on sublanes, nodes on lanes.
        hb = hb_ref[...].astype(jnp.int32)                            # (1, TN)
        tn = hb.shape[1]
        gid = jax.lax.broadcasted_iota(jnp.int32, (G_oh, tn), 0)      # (G_oh, TN)
        onehot = (gid == hb).astype(jnp.float32)                      # (G_oh, TN)

        # global_add_pool of the scores: scatter-add via one-hot contraction over the
        # node (lane) axis: (1, TN) x (G_oh, TN)^T -> (1, G_oh) on the MXU.
        r = jax.lax.dot_general(s, onehot, (((1,), (1,)), ((), ())),
                                preferred_element_type=jnp.float32)   # (1, G_oh)
        out_ref[:, :G_oh] += r

        # Add the bias exactly once (split 0, last tile). Padded output columns are
        # sliced off in the wrapper, so the broadcast add over them is harmless.
        @pl.when(jnp.logical_and(c == 0, i == pl.num_programs(1) - 1))
        def _():
            out_ref[...] += b_ref[0, 0]

    return kernel


def mpgnn_head(h, h_batch, weight, bias, num_graphs, *,
               node_tile=None, num_core_splits=None,
               compute_dtype=jnp.bfloat16):
    """MPGNNHead forward.

    h:        [N, H] f32 node features
    h_batch:  [N]    int graph assignment in [0, num_graphs)
    weight:   [1, H] Linear(num_hidden, 1) weight
    bias:     [1]    Linear bias
    returns   [num_graphs] f32
    """
    N, H = h.shape
    G = num_graphs

    if num_core_splits is None:
        num_core_splits = _default_num_core_splits()
    if node_tile is None:
        # Sweepable: 4096-8192 on v5e/v6e, 8192-32768 on v7x (HBM ~2.3x faster/TC).
        node_tile = 16384 if num_core_splits >= 2 else 8192
    assert node_tile % 128 == 0, "node_tile must be a multiple of 128 (lane width)"

    G_oh = _round_up(G, 8)      # one-hot rows (sublane multiple, kept small for VALU)
    G_acc = _round_up(G, 128)   # lane-dense accumulator / output width

    # Narrow id stream (widened to int32 inside the kernel before the compare).
    if G <= 126:
        id_dtype = jnp.int8
    elif G <= 32766:
        id_dtype = jnp.int16
    else:
        id_dtype = jnp.int32

    # Pad the node axis to a multiple of node_tile * num_core_splits.
    pad_to = node_tile * num_core_splits
    n_pad = _round_up(N, pad_to)

    # Lane-dense feature layout: cast -> transpose -> pad on the lane axis only, so XLA
    # fuses the prep into a single materialization of h^T.
    # TODO(synk): in a full pipeline the producer kernel should emit h already as [H, N]
    # in compute_dtype, eliminating this HBM pass entirely.
    hT = h.astype(compute_dtype).T                               # [H, N]
    if n_pad != N:
        hT = jnp.pad(hT, ((0, 0), (0, n_pad - N)))               # zeros: finite, no-op rows
    hb = h_batch.astype(id_dtype)
    if n_pad != N:
        hb = jnp.pad(hb, (0, n_pad - N), constant_values=G)      # dropped / zero column
    hb2d = hb.reshape(1, n_pad)                                  # nodes on lanes
    w2d = weight.astype(compute_dtype).reshape(1, H)             # [1, H]
    b2d = bias.astype(jnp.float32).reshape(1, 1)                 # [1, 1] -> SMEM

    tiles_total = n_pad // node_tile
    tiles_per_split = tiles_total // num_core_splits
    grid = (num_core_splits, tiles_per_split)

    # VMEM budget: 2 pipeline buffers per input stream + one-hot/weight/acc slack.
    feat_elem = jnp.dtype(compute_dtype).itemsize
    id_elem = jnp.dtype(id_dtype).itemsize
    per_tile_bytes = node_tile * (H * feat_elem + id_elem)
    vmem_limit = int(min(48 * 2**20, max(8 * 2**20, 2 * per_tile_bytes + (4 << 20))))

    partials = pl.pallas_call(
        make_mpgnn_head_kernel(G_oh),
        out_shape=jax.ShapeDtypeStruct((num_core_splits, 1, G_acc), jnp.float32),
        grid_spec=pltpu.PrefetchScalarGridSpec(
            num_scalar_prefetch=0,
            grid=grid,
            in_specs=[
                # graph ids: nodes on lanes (unmasked loads)
                pl.BlockSpec((1, node_tile),
                             lambda c, i: (0, c * tiles_per_split + i)),
                # node features h^T: nodes on lanes (lane-dense)
                pl.BlockSpec((H, node_tile),
                             lambda c, i: (0, c * tiles_per_split + i)),
                # weight, resident in VMEM
                pl.BlockSpec((1, H), lambda c, i: (0, 0)),
                # bias, resident in SMEM (scalar read)
                pl.BlockSpec(memory_space=pltpu.MemorySpace.SMEM),
            ],
            out_specs=pl.BlockSpec((None, 1, G_acc), lambda c, i: (c, 0, 0)),
        ),
        compiler_params=pltpu.CompilerParams(
            dimension_semantics=("parallel", "arbitrary"),
            vmem_limit_bytes=vmem_limit,
        ),
    )(hb2d, hT, w2d, b2d)

    # Sum per-core-split partials (bias was added exactly once in the kernel) and drop
    # the lane padding; result is [G], matching the module's squeeze(1).
    return partials[:, 0, :G].sum(axis=0)


def reference(h, h_batch, weight, bias, num_graphs):
    pooled = jax.ops.segment_sum(h, h_batch, num_segments=num_graphs)  # global_add_pool
    pred = pooled @ weight.T + bias                                    # Linear(H, 1)
    return pred[:, 0]                                                  # squeeze(1)


if __name__ == "__main__":
    key = jax.random.PRNGKey(0)
    k_h1, k_h2, k_w, k_b = jax.random.split(key, 4)

    H = 32   # num_hidden
    G = 8    # graphs in the batch

    # Deterministic Linear(num_hidden, 1) parameters
    weight = jax.random.normal(k_w, (1, H), dtype=jnp.float32) * (1.0 / jnp.sqrt(H))
    bias = jax.random.normal(k_b, (1,), dtype=jnp.float32) * 0.1

    # --- Case 1: small batch (exercises the padding path; single tile per split) ---
    N1 = 1000
    h1 = jax.random.normal(k_h1, (N1, H), dtype=jnp.float32)
    hb1 = jnp.repeat(jnp.arange(G, dtype=jnp.int32), N1 // G)
    ref1 = reference(h1, hb1, weight, bias, G)

    out1_f32 = jax.block_until_ready(
        mpgnn_head(h1, hb1, weight, bias, G, compute_dtype=jnp.float32))
    assert out1_f32.shape == (G,)
    assert jnp.allclose(out1_f32, ref1, atol=1e-3, rtol=1e-4), (out1_f32, ref1)

    out1_bf16 = jax.block_until_ready(
        mpgnn_head(h1, hb1, weight, bias, G))              # bf16 default feature stream
    assert out1_bf16.shape == (G,)
    assert jnp.allclose(out1_bf16, ref1, atol=0.25, rtol=0.05), (out1_bf16, ref1)

    # --- Case 2: multi-tile reduction + 2-way core split (v7x-style), exact f32 ---
    N2 = 20000
    h2 = jax.random.normal(k_h2, (N2, H), dtype=jnp.float32)
    hb2 = jnp.repeat(jnp.arange(G, dtype=jnp.int32), N2 // G)
    ref2 = reference(h2, hb2, weight, bias, G)

    out2 = jax.block_until_ready(
        mpgnn_head(h2, hb2, weight, bias, G, node_tile=8192,
                   num_core_splits=2, compute_dtype=jnp.float32))
    assert out2.shape == (G,)
    assert jnp.allclose(out2, ref2, atol=5e-3, rtol=1e-3), (out2, ref2)

    print("KERNEL_OK")
</pallas_src>

<mosaic_0001>
module attributes {stable_mosaic.version = 11 : i64} {
  func.func @kernel(%arg0: i32, %arg1: i32, %arg2: memref<1x8192xi8, #tpu.memory_space<vmem>>, %arg3: memref<32x8192xf32, #tpu.memory_space<vmem>>, %arg4: memref<1x32xf32, #tpu.memory_space<vmem>>, %arg5: memref<1x1xf32, #tpu.memory_space<smem>>, %arg6: memref<1x1x128xf32, #tpu.memory_space<vmem>>) attributes {dimension_semantics = [#tpu.dimension_semantics<parallel>, #tpu.dimension_semantics<arbitrary>], iteration_bounds = array<i64: 1, 1>, scalar_prefetch = 0 : i64, scratch_operands = 0 : i64, tpu.core_type = #tpu.core_type<tc>, window_params = [{transform_indices = @transform_0, window_bounds = array<i64: 1, 8192>}, {transform_indices = @transform_1, window_bounds = array<i64: 32, 8192>}, {pipeline_mode = #tpu.pipeline_mode<synchronous>, transform_indices = @transform_2, window_bounds = array<i64: 1, 32>}, {transform_indices = @transform_3, window_bounds = array<i64: 1, 1>}, {transform_indices = @transform_4, window_bounds = array<i64: 1, 1, 128>}]} {
    %c0_i32 = arith.constant 0 : i32
    %0 = arith.cmpi eq, %arg1, %c0_i32 : i32
    %1 = arith.extui %0 : i1 to i32
    %c0_i32_0 = arith.constant 0 : i32
    %2 = arith.cmpi ne, %1, %c0_i32_0 : i32
    scf.if %2 {
      %cst_16 = arith.constant 0.000000e+00 : f32
      %25 = vector.broadcast %cst_16 : f32 to vector<1x128xf32>
      %c0_17 = arith.constant 0 : index
      %c0_18 = arith.constant 0 : index
      %c0_19 = arith.constant 0 : index
      %26 = vector.load %arg6[%c0_17, %c0_18, %c0_19] : memref<1x1x128xf32, #tpu.memory_space<vmem>>, vector<1x1x128xf32>
      %27 = vector.shape_cast %26 : vector<1x1x128xf32> to vector<1x128xf32>
      %28 = vector.shape_cast %25 : vector<1x128xf32> to vector<1x1x128xf32>
      tpu.vector_store %arg6[%c0_17, %c0_18, %c0_19], %28 {strides = array<i32>} : memref<1x1x128xf32, #tpu.memory_space<vmem>>, vector<1x1x128xf32>,
    } else {
    }
    %c0 = arith.constant 0 : index
    %c0_1 = arith.constant 0 : index
    %3 = vector.load %arg3[%c0, %c0_1] : memref<32x8192xf32, #tpu.memory_space<vmem>>, vector<32x8192xf32>
    %c0_2 = arith.constant 0 : index
    %c0_3 = arith.constant 0 : index
    %4 = vector.load %arg4[%c0_2, %c0_3] : memref<1x32xf32, #tpu.memory_space<vmem>>, vector<1x32xf32>
    %cst = arith.constant dense<0.000000e+00> : vector<1x8192xf32>
    %5 = tpu.matmul %4, %3, %cst {dimension_numbers = #tpu.dot_dimension_numbers<[1], [0], [0], [1], [0, 0, 1, 1], [], []>} : vector<1x32xf32>, vector<32x8192xf32>, vector<1x8192xf32> -> vector<1x8192xf32>
    %c0_4 = arith.constant 0 : index
    %c0_5 = arith.constant 0 : index
    %6 = vector.load %arg2[%c0_4, %c0_5] : memref<1x8192xi8, #tpu.memory_space<vmem>>, vector<1x8192xi8>
    %7 = arith.extsi %6 : vector<1x8192xi8> to vector<1x8192xi32>
    %8 = tpu.iota {dimensions = array<i32: 0>} : vector<8x8192xi32>
    %9 = vector.broadcast %7 : vector<1x8192xi32> to vector<8x8192xi32>
    %10 = arith.cmpi eq, %8, %9 : vector<8x8192xi32>
    %11 = arith.extui %10 : vector<8x8192xi1> to vector<8x8192xi32>
    %12 = arith.sitofp %11 : vector<8x8192xi32> to vector<8x8192xf32>
    %cst_6 = arith.constant dense<0.000000e+00> : vector<1x8xf32>
    %13 = tpu.matmul %5, %12, %cst_6 {dimension_numbers = #tpu.dot_dimension_numbers<[1], [1], [0], [0], [0, 0, 1, 0], [], []>} : vector<1x8192xf32>, vector<8x8192xf32>, vector<1x8xf32> -> vector<1x8xf32>
    %c0_7 = arith.constant 0 : index
    %c0_8 = arith.constant 0 : index
    %c0_9 = arith.constant 0 : index
    %14 = vector.load %arg6[%c0_7, %c0_8, %c0_9] : memref<1x1x128xf32, #tpu.memory_space<vmem>>, vector<1x1x8xf32>
    %15 = vector.shape_cast %14 : vector<1x1x8xf32> to vector<1x8xf32>
    %16 = arith.addf %15, %13 : vector<1x8xf32>
    %c0_10 = arith.constant 0 : index
    %c0_11 = arith.constant 0 : index
    %c0_12 = arith.constant 0 : index
    %17 = vector.load %arg6[%c0_10, %c0_11, %c0_12] : memref<1x1x128xf32, #tpu.memory_space<vmem>>, vector<1x1x8xf32>
    %18 = vector.shape_cast %17 : vector<1x1x8xf32> to vector<1x8xf32>
    %19 = vector.shape_cast %16 : vector<1x8xf32> to vector<1x1x8xf32>
    tpu.vector_store %arg6[%c0_10, %c0_11, %c0_12], %19 {strides = array<i32>} : memref<1x1x128xf32, #tpu.memory_space<vmem>>, vector<1x1x8xf32>,
    %c0_i32_13 = arith.constant 0 : i32
    %20 = arith.cmpi eq, %arg0, %c0_i32_13 : i32
    %c0_i32_14 = arith.constant 0 : i32
    %21 = arith.cmpi eq, %arg1, %c0_i32_14 : i32
    %22 = arith.andi %20, %21 : i1
    %23 = arith.extui %22 : i1 to i32
    %c0_i32_15 = arith.constant 0 : i32
    %24 = arith.cmpi ne, %23, %c0_i32_15 : i32
    scf.if %24 {
      %c0_16 = arith.constant 0 : index
      %c0_17 = arith.constant 0 : index
      %c0_18 = arith.constant 0 : index
      %25 = vector.load %arg6[%c0_16, %c0_17, %c0_18] : memref<1x1x128xf32, #tpu.memory_space<vmem>>, vector<1x1x128xf32>
      %26 = vector.shape_cast %25 : vector<1x1x128xf32> to vector<1x128xf32>
      %c0_19 = arith.constant 0 : index
      %c0_20 = arith.constant 0 : index
      %27 = memref.load %arg5[%c0_19, %c0_20] : memref<1x1xf32, #tpu.memory_space<smem>>
      %28 = vector.broadcast %27 : f32 to vector<1x128xf32>
      %29 = arith.addf %26, %28 : vector<1x128xf32>
      %c0_21 = arith.constant 0 : index
      %c0_22 = arith.constant 0 : index
      %c0_23 = arith.constant 0 : index
      %30 = vector.load %arg6[%c0_21, %c0_22, %c0_23] : memref<1x1x128xf32, #tpu.memory_space<vmem>>, vector<1x1x128xf32>
      %31 = vector.shape_cast %30 : vector<1x1x128xf32> to vector<1x128xf32>
      %32 = vector.shape_cast %29 : vector<1x128xf32> to vector<1x1x128xf32>
      tpu.vector_store %arg6[%c0_21, %c0_22, %c0_23], %32 {strides = array<i32>} : memref<1x1x128xf32, #tpu.memory_space<vmem>>, vector<1x1x128xf32>,
    } else {
    }
    return
  }
  func.func @transform_0(%arg0: i32, %arg1: i32) -> (i32, i32) {
    %c1_i32 = arith.constant 1 : i32
    %0 = arith.muli %arg0, %c1_i32 : i32
    %1 = arith.addi %0, %arg1 : i32
    %c0_i32 = arith.constant 0 : i32
    %c0_i32_0 = arith.constant 0 : i32
    return %c0_i32, %1 : i32, i32
  }
  func.func @transform_1(%arg0: i32, %arg1: i32) -> (i32, i32) {
    %c1_i32 = arith.constant 1 : i32
    %0 = arith.muli %arg0, %c1_i32 : i32
    %1 = arith.addi %0, %arg1 : i32
    %c0_i32 = arith.constant 0 : i32
    %c0_i32_0 = arith.constant 0 : i32
    return %c0_i32, %1 : i32, i32
  }
  func.func @transform_2(%arg0: i32, %arg1: i32) -> (i32, i32) {
    %c0_i32 = arith.constant 0 : i32
    %c0_i32_0 = arith.constant 0 : i32
    %c0_i32_1 = arith.constant 0 : i32
    return %c0_i32, %c0_i32_0 : i32, i32
  }
  func.func @transform_3(%arg0: i32, %arg1: i32) -> (i32, i32) {
    %c0_i32 = arith.constant 0 : i32
    %c0_i32_0 = arith.constant 0 : i32
    %c0_i32_1 = arith.constant 0 : i32
    return %c0_i32, %c0_i32_0 : i32, i32
  }
  func.func @transform_4(%arg0: i32, %arg1: i32) -> (i32, i32, i32) {
    %c0_i32 = arith.constant 0 : i32
    %c0_i32_0 = arith.constant 0 : i32
    %c0_i32_1 = arith.constant 0 : i32
    return %arg0, %c0_i32, %c0_i32_0 : i32, i32, i32
  }
}

</mosaic_0001>

<bundles_post_ra>
// kernel: tpu_custom_call.1
= control target key start
LH: loop header
LB: loop body
LE: loop exit
PB: predicated region body
PF: predicated region fallthrough
CT: control target
= control target key end

     0   :  { %10 = vsyncpa [#allocation4], 0  ;;  %s6592_s0 = inlined_call_operand.hbm [shape: s8[1,8192], index: 0, kind: input, shape index: {}]   ;;  %s6593_s1 = inlined_call_operand.hbm [shape: f32[32,8192], index: 1, kind: input, shape index: {}]   ;;  %s6594_s2 = inlined_call_operand.vmem [shape: f32[1,32], index: 2, kind: input, shape index: {}]   ;;  %s6595_s3 = inlined_call_operand.<no memory space> [shape: f32[1,1], index: 3, kind: input, shape index: {}]   ;;  %s6596_s4 = inlined_call_operand.hbm [shape: f32[1,1,128], index: 4, kind: output, shape index: {}]  }
   0x1   :  { %11 = vsyncpa [#allocation7], 0 }
   0x2   :  { %12 = vsyncpa [#allocation5], 0  ;;  %s6107_s15 = smov [#allocation3]   ;;  %s6108_s17 = smov [#allocation6]  }
   0x3   :  { %s23_s16 = sshll.u32 %s6107_s15, 4  ;;  %s36_s18 = sshll.u32 %s6108_s17, 4  ;;  %s24_s16 = int_to_ptr.vmem [resolvable:$true] %s23_s16  ;;  %s6139_s18 = int_to_ptr.vmem [resolvable:$true] %s36_s18 }
   0x4   :  { %s6035_s21 = scalar_lea.hbm %s6592_s0, 1024 }
   0x5   :  { %p6036_p0 = scmp.ne.s32.totalorder %s6592_s0, %s6035_s21  ;;  %p6039_p1 = scmp.lt.u32.totalorder %s6035_s21, %s6592_s0 }
   0x7   :  { %p6041_p2 = pnand %p6039_p1, %p6036_p0 }
   0x9   :  { %6044 = shalt.err (!%p6041_p2)
}
   0xa   :  { %s6045_s26 = scalar_lea.vmem %s24_s16, 1024  ;;  %p6050_p4 = scmp.lt.s32.totalorder %s24_s16, %s24_s16 }
   0xb   :  { %p6046_p3 = scmp.ne.s32.totalorder %s24_s16, %s6045_s26  ;;  %p6051_p5 = scmp.lt.s32.totalorder %s6045_s26, %s6045_s26 }
   0xd   :  { %p6052_p6 = por %p6051_p5, %p6050_p4 }
   0xf   :  { %p6053_p7 = pnand %p6052_p6, %p6046_p3 }
  0x11   :  { %6056 = shalt.err (!%p6053_p7)
}
  0x12   :  { %26 = dma.hbm_to_vmem [thread:$0]  %s6592_s0, 1024, %s24_s16, [#allocation4]  }
  0x13   :  { %s6057_s5 = scalar_lea.hbm %s6593_s1, 32768 }
  0x14   :  { %p6058_p8 = scmp.ne.s32.totalorder %s6593_s1, %s6057_s5  ;;  %p6061_p9 = scmp.lt.u32.totalorder %s6057_s5, %s6593_s1 }
  0x16   :  { %p6063_p10 = pnand %p6061_p9, %p6058_p8 }
  0x18   :  { %6066 = shalt.err (!%p6063_p10)
}
  0x19   :  { %s6067_s10 = scalar_lea.vmem %s6139_s18, 32768  ;;  %p6072_p12 = scmp.lt.s32.totalorder %s6139_s18, %s6139_s18 }
  0x1a   :  { %p6068_p11 = scmp.ne.s32.totalorder %s6139_s18, %s6067_s10  ;;  %p6073_p13 = scmp.lt.s32.totalorder %s6067_s10, %s6067_s10 }
  0x1c   :  { %p6074_p0 = por %p6073_p13, %p6072_p12 }
  0x1e   :  { %p6075_p1 = pnand %p6074_p0, %p6068_p11 }
  0x20   :  { %6078 = shalt.err (!%p6075_p1)
}
  0x21   :  { %s6109_s0 = smov 8192   ;;  %s6110_s11 = smov 512  }
  0x22   :  { %42 = dma.hbm_to_vmem [thread:$0]  %s6593_s1, 32768, %s6139_s18, [#allocation7], %s6109_s0, %s6109_s0, %s6110_s11  }
  0x23   :  { %6101 = dma.done.wait [#allocation4], 1024  }
  0x24   :  { %6102 = vsyncadd [#allocation4], 4294966272 }
  0x25   :  { %6103 = dma.done.wait [#allocation7], 32768  }
  0x26   :  { %6104 = vsyncadd [#allocation7], 4294934528  ;;  %v6111_v0 = vmov 0.0   ;;  %v63_v1 = vld [vmem:[#allocation6 + $0x8] sm:$0xff]  ;;  %v65_v3 = vld [vmem:[#allocation6 + $0x18] sm:$0xff]  ;;  %vm319_vm0 = vcmask 261120  }
  0x27   :  { %387 = vmatprep.mubr.f32.mxu0 %v6111_v0  ;;  %61 = vst [vmem:[#allocation8] sm:$0x1] %v6111_v0  ;;  %458 = vmatprep.mubr.f32.mxu1 %v6111_v0  ;;  %v127_v2 = vld [vmem:[#allocation6 + $0x208] sm:$0xff]  ;;  %v129_v5 = vld [vmem:[#allocation6 + $0x218] sm:$0xff]  ;;  %v62_v6 = vld [vmem:[#allocation6] sm:$0xff]  ;;  %s6113_s18 = smov [#allocation8]  }
  0x28   :  { %v5771_v4 = vpack.c.bf16 %v127_v2, %v63_v1  ;;  %v126_v7 = vld [vmem:[#allocation6 + $0x200] sm:$0xff]  ;;  %v5779_v8 = vpack.c.bf16 %v129_v5, %v65_v3  ;;  %v64_v10 = vld [vmem:[#allocation6 + $0x10] sm:$0xff]  ;;  %v191_v12 = vld [vmem:[#allocation6 + $0x408] sm:$0xff]  ;;  %s5601_s19 = sshll.u32 %s6113_s18, 4  ;;  %s5602_s19 = int_to_ptr.vmem [resolvable:$true] %s5601_s19 }
  0x29   :  { %v5773_v9 = vpack.c.bf16 %v126_v7, %v62_v6  ;;  %v128_v11 = vld [vmem:[#allocation6 + $0x210] sm:$0xff]  ;;  %v255_v14 = vld [vmem:[#allocation6 + $0x608] sm:$0xff]  ;;  %v193_v15 = vld [vmem:[#allocation6 + $0x418] sm:$0xff]  ;;  %s6079_s20 = scalar_lea.vmem %s5602_s19, 16  ;;  %s6083_s21 = scalar_lea.vmem %s5602_s19, 32 }
  0x2a   :  { %5772 = vmatprep.subr.bf16.mxu0 %v5771_v4  ;;  %v5781_v13 = vpack.c.bf16 %v128_v11, %v64_v10  ;;  %v257_v16 = vld [vmem:[#allocation6 + $0x618] sm:$0xff]  ;;  %5780 = vmatprep.subr.bf16.mxu1 %v5779_v8  ;;  %v5775_v17 = vpack.c.bf16 %v255_v14, %v191_v12  ;;  %v190_v19 = vld [vmem:[#allocation6 + $0x400] sm:$0xff]  ;;  %v192_v21 = vld [vmem:[#allocation6 + $0x410] sm:$0xff]  ;;  %p6080_p2 = scmp.ne.s32.totalorder %s5602_s19, %s6079_s20  ;;  %p6084_p3 = scmp.lt.s32.totalorder %s5602_s19, %s5602_s19 }
  0x2b   :  { %5774 = vmatpush1.bf16.msra.mxu0 %v5773_v9  ;;  %v5783_v18 = vpack.c.bf16 %v257_v16, %v193_v15  ;;  %v254_v20 = vld [vmem:[#allocation6 + $0x600] sm:$0xff]  ;;  %v256_v23 = vld [vmem:[#allocation6 + $0x610] sm:$0xff]  ;;  %v67_v24 = vld [vmem:[#allocation6 + $0x28] sm:$0xff]  ;;  %p6085_p4 = scmp.lt.s32.totalorder %s6083_s21, %s6079_s20 }
  0x2c   :  { %5782 = vmatpush1.bf16.msra.mxu1 %v5781_v13  ;;  %v5777_v22 = vpack.c.bf16 %v254_v20, %v190_v19  ;;  %5776 = vmatprep.subr.bf16.mxu0 %v5775_v17  ;;  %v5785_v25 = vpack.c.bf16 %v256_v23, %v192_v21  ;;  %v6176_v26 = vld [vmem:[%s6594_s2] sm:$0x1]  ;;  %v131_v27 = vld [vmem:[#allocation6 + $0x228] sm:$0xff]  ;;  %v69_v28 = vld [vmem:[#allocation6 + $0x38] sm:$0xff] }
  0x2d   :  { %5784 = vmatprep.subr.bf16.mxu1 %v5783_v18  ;;  %v133_v29 = vld [vmem:[#allocation6 + $0x238] sm:$0xff]  ;;  %v5787_v30 = vpack.c.bf16 %v131_v27, %v67_v24  ;;  %v66_v32 = vld [vmem:[#allocation6 + $0x20] sm:$0xff]  ;;  %v68_v34 = vld [vmem:[#allocation6 + $0x30] sm:$0xff]  ;;  %p6086_p5 = por %p6085_p4, %p6084_p3 }
  0x2e   :  { %v5795_v31 = vpack.c.bf16 %v133_v29, %v69_v28  ;;  %v130_v33 = vld [vmem:[#allocation6 + $0x220] sm:$0xff]  ;;  %v132_v36 = vld [vmem:[#allocation6 + $0x230] sm:$0xff]  ;;  %v195_v37 = vld [vmem:[#allocation6 + $0x428] sm:$0xff] }
  0x2f   :  { %5778 = vmatpush1.bf16.msra.mxu0 %v5777_v22  ;;  %v5789_v35 = vpack.c.bf16 %v130_v33, %v66_v32  ;;  %v259_v38 = vld [vmem:[#allocation6 + $0x628] sm:$0xff]  ;;  %v5797_v39 = vpack.c.bf16 %v132_v36, %v68_v34  ;;  %v197_v41 = vld [vmem:[#allocation6 + $0x438] sm:$0xff]  ;;  %v194_v43 = vld [vmem:[#allocation6 + $0x420] sm:$0xff]  ;;  %p6087_p6 = pnand %p6086_p5, %p6080_p2 }
  0x30   :  { %5786 = vmatpush1.bf16.msra.mxu1 %v5785_v25  ;;  %5788 = vmatprep.subr.bf16.mxu0 %v5787_v30  ;;  %v5791_v40 = vpack.c.bf16 %v259_v38, %v195_v37  ;;  %v261_v42 = vld [vmem:[#allocation6 + $0x638] sm:$0xff]  ;;  %v258_v45 = vld [vmem:[#allocation6 + $0x620] sm:$0xff]  ;;  %v196_v46 = vld [vmem:[#allocation6 + $0x430] sm:$0xff] }
  0x31   :  { %5796 = vmatprep.subr.bf16.mxu1 %v5795_v31  ;;  %v5799_v44 = vpack.c.bf16 %v261_v42, %v197_v41  ;;  %v260_v47 = vld [vmem:[#allocation6 + $0x630] sm:$0xff]  ;;  %v71_v48 = vld [vmem:[#allocation6 + $0x48] sm:$0xff]  ;;  %v73_v50 = vld [vmem:[#allocation6 + $0x58] sm:$0xff]  ;;  %v5793_v51 = vpack.c.bf16 %v258_v45, %v194_v43 }
  0x32   :  { %5611 = vmatmul.mubr.msk.f32.vlgmr.msra.gmra.mrb[0].mxu0 %vm319_vm0, %v6176_v26  ;;  %v135_v49 = vld [vmem:[#allocation6 + $0x248] sm:$0xff]  ;;  %v137_v52 = vld [vmem:[#allocation6 + $0x258] sm:$0xff]  ;;  %v5801_v53 = vpack.c.bf16 %v260_v47, %v196_v46  ;;  %v70_v55 = vld [vmem:[#allocation6 + $0x40] sm:$0xff] }
  0x33   :  { %5612 = vmatmul.mubr.msk.f32.vlgmr.msra.gmra.mrb[0].mxu1 %vm319_vm0, %v6176_v26  ;;  %5790 = vmatpush1.bf16.msra.mxu0 %v5789_v35  ;;  %v5803_v54 = vpack.c.bf16 %v135_v49, %v71_v48  ;;  %v134_v56 = vld [vmem:[#allocation6 + $0x240] sm:$0xff]  ;;  %v72_v57 = vld [vmem:[#allocation6 + $0x50] sm:$0xff]  ;;  %v5811_v58 = vpack.c.bf16 %v137_v52, %v73_v50  ;;  %v199_v60 = vld [vmem:[#allocation6 + $0x448] sm:$0xff] }
  0x34   :  { %5798 = vmatpush1.bf16.msra.mxu1 %v5797_v39  ;;  %5792 = vmatprep.subr.bf16.mxu0 %v5791_v40  ;;  %v136_v59 = vld [vmem:[#allocation6 + $0x250] sm:$0xff]  ;;  %v263_v61 = vld [vmem:[#allocation6 + $0x648] sm:$0xff]  ;;  %v201_v62 = vld [vmem:[#allocation6 + $0x458] sm:$0xff]  ;;  %v5805_v1 = vpack.c.bf16 %v134_v56, %v70_v55 }
  0x35   :  { %5800 = vmatprep.subr.bf16.mxu1 %v5799_v44  ;;  %529 = vmatprep.mubr.f32.mxu0 %v6111_v0  ;;  %v265_v63 = vld [vmem:[#allocation6 + $0x658] sm:$0xff]  ;;  %v5813_v2 = vpack.c.bf16 %v136_v59, %v72_v57  ;;  %v5807_v3 = vpack.c.bf16 %v263_v61, %v199_v60  ;;  %v198_v4 = vld [vmem:[#allocation6 + $0x440] sm:$0xff]  ;;  %v200_v6 = vld [vmem:[#allocation6 + $0x450] sm:$0xff] }
  0x36   :  { %600 = vmatprep.mubr.f32.mxu1 %v6111_v0  ;;  %v262_v5 = vld [vmem:[#allocation6 + $0x640] sm:$0xff]  ;;  %v5815_v7 = vpack.c.bf16 %v265_v63, %v201_v62  ;;  %v264_v8 = vld [vmem:[#allocation6 + $0x650] sm:$0xff]  ;;  %v75_v9 = vld [vmem:[#allocation6 + $0x68] sm:$0xff] }
  0x37   :  { %5794 = vmatpush1.bf16.msra.mxu0 %v5793_v51  ;;  %v139_v10 = vld [vmem:[#allocation6 + $0x268] sm:$0xff]  ;;  %v77_v11 = vld [vmem:[#allocation6 + $0x78] sm:$0xff]  ;;  %v5809_v13 = vpack.c.bf16 %v262_v5, %v198_v4  ;;  %v5817_v14 = vpack.c.bf16 %v264_v8, %v200_v6  ;;  %v74_v16 = vld [vmem:[#allocation6 + $0x60] sm:$0xff] }
  0x38   :  { %5802 = vmatpush1.bf16.msra.mxu1 %v5801_v53  ;;  %5804 = vmatprep.subr.bf16.mxu0 %v5803_v54  ;;  %v141_v12 = vld [vmem:[#allocation6 + $0x278] sm:$0xff]  ;;  %v5819_v15 = vpack.c.bf16 %v139_v10, %v75_v9  ;;  %v138_v17 = vld [vmem:[#allocation6 + $0x260] sm:$0xff]  ;;  %v76_v18 = vld [vmem:[#allocation6 + $0x70] sm:$0xff] }
  0x39   :  { %5812 = vmatprep.subr.bf16.mxu1 %v5811_v58  ;;  %v5827_v19 = vpack.c.bf16 %v141_v12, %v77_v11  ;;  %v140_v20 = vld [vmem:[#allocation6 + $0x270] sm:$0xff]  ;;  %v203_v21 = vld [vmem:[#allocation6 + $0x468] sm:$0xff]  ;;  %v205_v23 = vld [vmem:[#allocation6 + $0x478] sm:$0xff]  ;;  %v5821_v25 = vpack.c.bf16 %v138_v17, %v74_v16 }
  0x3a   :  { %5613 = vmatmul.mubr.msk.f32.vlgmr.msra.gmra.mrb[2].mxu0 %vm319_vm0, %v6176_v26  ;;  %v267_v22 = vld [vmem:[#allocation6 + $0x668] sm:$0xff]  ;;  %v269_v24 = vld [vmem:[#allocation6 + $0x678] sm:$0xff]  ;;  %v5829_v27 = vpack.c.bf16 %v140_v20, %v76_v18  ;;  %v202_v29 = vld [vmem:[#allocation6 + $0x460] sm:$0xff] }
  0x3b   :  { %5614 = vmatmul.mubr.msk.f32.vlgmr.msra.gmra.mrb[2].mxu1 %vm319_vm0, %v6176_v26  ;;  %5806 = vmatpush1.bf16.msra.mxu0 %v5805_v1  ;;  %v5823_v28 = vpack.c.bf16 %v267_v22, %v203_v21  ;;  %v266_v30 = vld [vmem:[#allocation6 + $0x660] sm:$0xff]  ;;  %v204_v31 = vld [vmem:[#allocation6 + $0x470] sm:$0xff]  ;;  %v5831_v32 = vpack.c.bf16 %v269_v24, %v205_v23  ;;  %v79_v34 = vld [vmem:[#allocation6 + $0x88] sm:$0xff] }
  0x3c   :  { %5814 = vmatpush1.bf16.msra.mxu1 %v5813_v2  ;;  %5808 = vmatprep.subr.bf16.mxu0 %v5807_v3  ;;  %v268_v33 = vld [vmem:[#allocation6 + $0x670] sm:$0xff]  ;;  %v143_v35 = vld [vmem:[#allocation6 + $0x288] sm:$0xff]  ;;  %v81_v36 = vld [vmem:[#allocation6 + $0x98] sm:$0xff]  ;;  %v5825_v38 = vpack.c.bf16 %v266_v30, %v202_v29 }
  0x3d   :  { %5816 = vmatprep.subr.bf16.mxu1 %v5815_v7  ;;  %671 = vmatprep.mubr.f32.mxu0 %v6111_v0  ;;  %v145_v37 = vld [vmem:[#allocation6 + $0x298] sm:$0xff]  ;;  %v5833_v39 = vpack.c.bf16 %v268_v33, %v204_v31  ;;  %v5835_v40 = vpack.c.bf16 %v143_v35, %v79_v34  ;;  %v78_v41 = vld [vmem:[#allocation6 + $0x80] sm:$0xff]  ;;  %v80_v43 = vld [vmem:[#allocation6 + $0x90] sm:$0xff] }
  0x3e   :  { %742 = vmatprep.mubr.f32.mxu1 %v6111_v0  ;;  %v142_v42 = vld [vmem:[#allocation6 + $0x280] sm:$0xff]  ;;  %v5843_v44 = vpack.c.bf16 %v145_v37, %v81_v36  ;;  %v144_v45 = vld [vmem:[#allocation6 + $0x290] sm:$0xff]  ;;  %v207_v46 = vld [vmem:[#allocation6 + $0x488] sm:$0xff] }
  0x3f   :  { %5810 = vmatpush1.bf16.msra.mxu0 %v5809_v13  ;;  %v271_v47 = vld [vmem:[#allocation6 + $0x688] sm:$0xff]  ;;  %v209_v48 = vld [vmem:[#allocation6 + $0x498] sm:$0xff]  ;;  %v5837_v50 = vpack.c.bf16 %v142_v42, %v78_v41  ;;  %v5845_v51 = vpack.c.bf16 %v144_v45, %v80_v43  ;;  %v206_v53 = vld [vmem:[#allocation6 + $0x480] sm:$0xff] }
  0x40   :  { %5818 = vmatpush1.bf16.msra.mxu1 %v5817_v14  ;;  %5820 = vmatprep.subr.bf16.mxu0 %v5819_v15  ;;  %v273_v49 = vld [vmem:[#allocation6 + $0x698] sm:$0xff]  ;;  %v5839_v52 = vpack.c.bf16 %v271_v47, %v207_v46  ;;  %v270_v54 = vld [vmem:[#allocation6 + $0x680] sm:$0xff]  ;;  %v208_v55 = vld [vmem:[#allocation6 + $0x490] sm:$0xff] }
  0x41   :  { %5828 = vmatprep.subr.bf16.mxu1 %v5827_v19  ;;  %v5847_v56 = vpack.c.bf16 %v273_v49, %v209_v48  ;;  %v272_v57 = vld [vmem:[#allocation6 + $0x690] sm:$0xff]  ;;  %v83_v58 = vld [vmem:[#allocation6 + $0xa8] sm:$0xff]  ;;  %v85_v60 = vld [vmem:[#allocation6 + $0xb8] sm:$0xff]  ;;  %v5841_v62 = vpack.c.bf16 %v270_v54, %v206_v53 }
  0x42   :  { %5615 = vmatmul.mubr.msk.f32.vlgmr.msra.gmra.mrb[4].mxu0 %vm319_vm0, %v6176_v26  ;;  %v147_v59 = vld [vmem:[#allocation6 + $0x2a8] sm:$0xff]  ;;  %v149_v61 = vld [vmem:[#allocation6 + $0x2b8] sm:$0xff]  ;;  %v5849_v63 = vpack.c.bf16 %v272_v57, %v208_v55  ;;  %v82_v2 = vld [vmem:[#allocation6 + $0xa0] sm:$0xff] }
  0x43   :  { %5616 = vmatmul.mubr.msk.f32.vlgmr.msra.gmra.mrb[4].mxu1 %vm319_vm0, %v6176_v26  ;;  %5822 = vmatpush1.bf16.msra.mxu0 %v5821_v25  ;;  %v5851_v1 = vpack.c.bf16 %v147_v59, %v83_v58  ;;  %v146_v3 = vld [vmem:[#allocation6 + $0x2a0] sm:$0xff]  ;;  %v84_v4 = vld [vmem:[#allocation6 + $0xb0] sm:$0xff]  ;;  %v5859_v5 = vpack.c.bf16 %v149_v61, %v85_v60  ;;  %v211_v7 = vld [vmem:[#allocation6 + $0x4a8] sm:$0xff] }
  0x44   :  { %5830 = vmatpush1.bf16.msra.mxu1 %v5829_v27  ;;  %5824 = vmatprep.subr.bf16.mxu0 %v5823_v28  ;;  %v148_v6 = vld [vmem:[#allocation6 + $0x2b0] sm:$0xff]  ;;  %v275_v8 = vld [vmem:[#allocation6 + $0x6a8] sm:$0xff]  ;;  %v213_v9 = vld [vmem:[#allocation6 + $0x4b8] sm:$0xff]  ;;  %v5853_v11 = vpack.c.bf16 %v146_v3, %v82_v2 }
  0x45   :  { %5832 = vmatprep.subr.bf16.mxu1 %v5831_v32  ;;  %813 = vmatprep.mubr.f32.mxu0 %v6111_v0  ;;  %v277_v10 = vld [vmem:[#allocation6 + $0x6b8] sm:$0xff]  ;;  %v5861_v12 = vpack.c.bf16 %v148_v6, %v84_v4  ;;  %v5855_v13 = vpack.c.bf16 %v275_v8, %v211_v7  ;;  %v210_v14 = vld [vmem:[#allocation6 + $0x4a0] sm:$0xff]  ;;  %v212_v16 = vld [vmem:[#allocation6 + $0x4b0] sm:$0xff] }
  0x46   :  { %884 = vmatprep.mubr.f32.mxu1 %v6111_v0  ;;  %v274_v15 = vld [vmem:[#allocation6 + $0x6a0] sm:$0xff]  ;;  %v5863_v17 = vpack.c.bf16 %v277_v10, %v213_v9  ;;  %v276_v18 = vld [vmem:[#allocation6 + $0x6b0] sm:$0xff]  ;;  %v87_v19 = vld [vmem:[#allocation6 + $0xc8] sm:$0xff] }
  0x47   :  { %5826 = vmatpush1.bf16.msra.mxu0 %v5825_v38  ;;  %v151_v20 = vld [vmem:[#allocation6 + $0x2c8] sm:$0xff]  ;;  %v89_v21 = vld [vmem:[#allocation6 + $0xd8] sm:$0xff]  ;;  %v5857_v23 = vpack.c.bf16 %v274_v15, %v210_v14  ;;  %v5865_v24 = vpack.c.bf16 %v276_v18, %v212_v16  ;;  %v86_v27 = vld [vmem:[#allocation6 + $0xc0] sm:$0xff] }
  0x48   :  { %5834 = vmatpush1.bf16.msra.mxu1 %v5833_v39  ;;  %5836 = vmatprep.subr.bf16.mxu0 %v5835_v40  ;;  %v153_v22 = vld [vmem:[#allocation6 + $0x2d8] sm:$0xff]  ;;  %v5867_v25 = vpack.c.bf16 %v151_v20, %v87_v19  ;;  %v150_v28 = vld [vmem:[#allocation6 + $0x2c0] sm:$0xff]  ;;  %v88_v29 = vld [vmem:[#allocation6 + $0xd0] sm:$0xff] }
  0x49   :  { %5844 = vmatprep.subr.bf16.mxu1 %v5843_v44  ;;  %v5875_v30 = vpack.c.bf16 %v153_v22, %v89_v21  ;;  %v152_v31 = vld [vmem:[#allocation6 + $0x2d0] sm:$0xff]  ;;  %v215_v32 = vld [vmem:[#allocation6 + $0x4c8] sm:$0xff]  ;;  %v217_v34 = vld [vmem:[#allocation6 + $0x4d8] sm:$0xff]  ;;  %v5869_v36 = vpack.c.bf16 %v150_v28, %v86_v27 }
  0x4a   :  { %5617 = vmatmul.mubr.msk.f32.vlgmr.msra.gmra.mrb[6].mxu0 %vm319_vm0, %v6176_v26  ;;  %v279_v33 = vld [vmem:[#allocation6 + $0x6c8] sm:$0xff]  ;;  %v281_v35 = vld [vmem:[#allocation6 + $0x6d8] sm:$0xff]  ;;  %v5877_v37 = vpack.c.bf16 %v152_v31, %v88_v29  ;;  %v214_v39 = vld [vmem:[#allocation6 + $0x4c0] sm:$0xff] }
  0x4b   :  { %5618 = vmatmul.mubr.msk.f32.vlgmr.msra.gmra.mrb[6].mxu1 %vm319_vm0, %v6176_v26  ;;  %5838 = vmatpush1.bf16.msra.mxu0 %v5837_v50  ;;  %v5871_v38 = vpack.c.bf16 %v279_v33, %v215_v32  ;;  %v278_v40 = vld [vmem:[#allocation6 + $0x6c0] sm:$0xff]  ;;  %v216_v41 = vld [vmem:[#allocation6 + $0x4d0] sm:$0xff]  ;;  %v5879_v42 = vpack.c.bf16 %v281_v35, %v217_v34  ;;  %v91_v44 = vld [vmem:[#allocation6 + $0xe8] sm:$0xff] }
  0x4c   :  { %5846 = vmatpush1.bf16.msra.mxu1 %v5845_v51  ;;  %5840 = vmatprep.subr.bf16.mxu0 %v5839_v52  ;;  %v280_v43 = vld [vmem:[#allocation6 + $0x6d0] sm:$0xff]  ;;  %v155_v45 = vld [vmem:[#allocation6 + $0x2e8] sm:$0xff]  ;;  %v93_v46 = vld [vmem:[#allocation6 + $0xf8] sm:$0xff]  ;;  %v5873_v48 = vpack.c.bf16 %v278_v40, %v214_v39 }
  0x4d   :  { %5848 = vmatprep.subr.bf16.mxu1 %v5847_v56  ;;  %955 = vmatprep.mubr.f32.mxu0 %v6111_v0  ;;  %v157_v47 = vld [vmem:[#allocation6 + $0x2f8] sm:$0xff]  ;;  %v5881_v49 = vpack.c.bf16 %v280_v43, %v216_v41  ;;  %v5883_v50 = vpack.c.bf16 %v155_v45, %v91_v44  ;;  %v90_v51 = vld [vmem:[#allocation6 + $0xe0] sm:$0xff]  ;;  %v92_v53 = vld [vmem:[#allocation6 + $0xf0] sm:$0xff] }
  0x4e   :  { %1026 = vmatprep.mubr.f32.mxu1 %v6111_v0  ;;  %v154_v52 = vld [vmem:[#allocation6 + $0x2e0] sm:$0xff]  ;;  %v5891_v54 = vpack.c.bf16 %v157_v47, %v93_v46  ;;  %v156_v55 = vld [vmem:[#allocation6 + $0x2f0] sm:$0xff]  ;;  %v219_v56 = vld [vmem:[#allocation6 + $0x4e8] sm:$0xff] }
  0x4f   :  { %5842 = vmatpush1.bf16.msra.mxu0 %v5841_v62  ;;  %v283_v57 = vld [vmem:[#allocation6 + $0x6e8] sm:$0xff]  ;;  %v221_v58 = vld [vmem:[#allocation6 + $0x4f8] sm:$0xff]  ;;  %v5885_v60 = vpack.c.bf16 %v154_v52, %v90_v51  ;;  %v5893_v61 = vpack.c.bf16 %v156_v55, %v92_v53  ;;  %v220_v2 = vld [vmem:[#allocation6 + $0x4f0] sm:$0xff] }
  0x50   :  { %5850 = vmatpush1.bf16.msra.mxu1 %v5849_v63  ;;  %5852 = vmatprep.subr.bf16.mxu0 %v5851_v1  ;;  %v285_v59 = vld [vmem:[#allocation6 + $0x6f8] sm:$0xff]  ;;  %v5887_v62 = vpack.c.bf16 %v283_v57, %v219_v56  ;;  %v218_v63 = vld [vmem:[#allocation6 + $0x4e0] sm:$0xff]  ;;  %v284_v4 = vld [vmem:[#allocation6 + $0x6f0] sm:$0xff] }
  0x51   :  { %5860 = vmatprep.subr.bf16.mxu1 %v5859_v5  ;;  %v282_v1 = vld [vmem:[#allocation6 + $0x6e0] sm:$0xff]  ;;  %v5895_v3 = vpack.c.bf16 %v285_v59, %v221_v58  ;;  %v95_v5 = vld [vmem:[#allocation6 + $0x108] sm:$0xff]  ;;  %v97_v7 = vld [vmem:[#allocation6 + $0x118] sm:$0xff]  ;;  %v5897_v10 = vpack.c.bf16 %v284_v4, %v220_v2 }
  0x52   :  { %5619 = vmatmul.mubr.msk.f32.vlgmr.msra.gmra.mrb[8].mxu0 %vm319_vm0, %v6176_v26  ;;  %v159_v6 = vld [vmem:[#allocation6 + $0x308] sm:$0xff]  ;;  %v161_v8 = vld [vmem:[#allocation6 + $0x318] sm:$0xff]  ;;  %v5889_v9 = vpack.c.bf16 %v282_v1, %v218_v63  ;;  %v96_v14 = vld [vmem:[#allocation6 + $0x110] sm:$0xff] }
  0x53   :  { %5620 = vmatmul.mubr.msk.f32.vlgmr.msra.gmra.mrb[8].mxu1 %vm319_vm0, %v6176_v26  ;;  %5854 = vmatpush1.bf16.msra.mxu0 %v5853_v11  ;;  %v5899_v11 = vpack.c.bf16 %v159_v6, %v95_v5  ;;  %v5907_v15 = vpack.c.bf16 %v161_v8, %v97_v7  ;;  %v160_v16 = vld [vmem:[#allocation6 + $0x310] sm:$0xff]  ;;  %v287_v18 = vld [vmem:[#allocation6 + $0x708] sm:$0xff]  ;;  %v225_v19 = vld [vmem:[#allocation6 + $0x518] sm:$0xff] }
  0x54   :  { %5862 = vmatpush1.bf16.msra.mxu1 %v5861_v12  ;;  %5856 = vmatprep.subr.bf16.mxu0 %v5855_v13  ;;  %v94_v12 = vld [vmem:[#allocation6 + $0x100] sm:$0xff]  ;;  %v289_v20 = vld [vmem:[#allocation6 + $0x718] sm:$0xff]  ;;  %v5909_v22 = vpack.c.bf16 %v160_v16, %v96_v14  ;;  %v224_v27 = vld [vmem:[#allocation6 + $0x510] sm:$0xff] }
  0x55   :  { %5864 = vmatprep.subr.bf16.mxu1 %v5863_v17  ;;  %1097 = vmatprep.mubr.f32.mxu0 %v6111_v0  ;;  %v158_v13 = vld [vmem:[#allocation6 + $0x300] sm:$0xff]  ;;  %v223_v17 = vld [vmem:[#allocation6 + $0x508] sm:$0xff]  ;;  %v5911_v28 = vpack.c.bf16 %v289_v20, %v225_v19  ;;  %v288_v29 = vld [vmem:[#allocation6 + $0x710] sm:$0xff] }
  0x56   :  { %1168 = vmatprep.mubr.f32.mxu1 %v6111_v0  ;;  %v5901_v21 = vpack.c.bf16 %v158_v13, %v94_v12  ;;  %v163_v31 = vld [vmem:[#allocation6 + $0x328] sm:$0xff]  ;;  %v101_v32 = vld [vmem:[#allocation6 + $0x138] sm:$0xff]  ;;  %v5913_v35 = vpack.c.bf16 %v288_v29, %v224_v27  ;;  %v100_v39 = vld [vmem:[#allocation6 + $0x130] sm:$0xff] }
  0x57   :  { %5858 = vmatpush1.bf16.msra.mxu0 %v5857_v23  ;;  %v5903_v23 = vpack.c.bf16 %v287_v18, %v223_v17  ;;  %v165_v33 = vld [vmem:[#allocation6 + $0x338] sm:$0xff]  ;;  %v164_v41 = vld [vmem:[#allocation6 + $0x330] sm:$0xff]  ;;  %v291_v43 = vld [vmem:[#allocation6 + $0x728] sm:$0xff] }
  0x58   :  { %5866 = vmatpush1.bf16.msra.mxu1 %v5865_v24  ;;  %5868 = vmatprep.subr.bf16.mxu0 %v5867_v25  ;;  %v222_v24 = vld [vmem:[#allocation6 + $0x500] sm:$0xff]  ;;  %v5923_v40 = vpack.c.bf16 %v165_v33, %v101_v32  ;;  %v229_v44 = vld [vmem:[#allocation6 + $0x538] sm:$0xff]  ;;  %v5925_v47 = vpack.c.bf16 %v164_v41, %v100_v39  ;;  %v228_v51 = vld [vmem:[#allocation6 + $0x530] sm:$0xff] }
  0x59   :  { %5876 = vmatprep.subr.bf16.mxu1 %v5875_v30  ;;  %v286_v25 = vld [vmem:[#allocation6 + $0x700] sm:$0xff]  ;;  %v99_v30 = vld [vmem:[#allocation6 + $0x128] sm:$0xff]  ;;  %v293_v45 = vld [vmem:[#allocation6 + $0x738] sm:$0xff] }
  0x5a   :  { %5621 = vmatmul.mubr.msk.f32.vlgmr.msra.gmra.mrb[10].mxu0 %vm319_vm0, %v6176_v26  ;;  %v5905_v34 = vpack.c.bf16 %v286_v25, %v222_v24  ;;  %v5927_v52 = vpack.c.bf16 %v293_v45, %v229_v44  ;;  %v292_v53 = vld [vmem:[#allocation6 + $0x730] sm:$0xff]  ;;  %v167_v55 = vld [vmem:[#allocation6 + $0x348] sm:$0xff]  ;;  %v105_v56 = vld [vmem:[#allocation6 + $0x158] sm:$0xff] }
  0x5b   :  { %5622 = vmatmul.mubr.msk.f32.vlgmr.msra.gmra.mrb[10].mxu1 %vm319_vm0, %v6176_v26  ;;  %5870 = vmatpush1.bf16.msra.mxu0 %v5869_v36  ;;  %v5915_v36 = vpack.c.bf16 %v163_v31, %v99_v30  ;;  %v169_v57 = vld [vmem:[#allocation6 + $0x358] sm:$0xff]  ;;  %v5929_v59 = vpack.c.bf16 %v292_v53, %v228_v51  ;;  %v104_v63 = vld [vmem:[#allocation6 + $0x150] sm:$0xff]  ;;  %v295_v4 = vld [vmem:[#allocation6 + $0x748] sm:$0xff] }
  0x5c   :  { %5878 = vmatpush1.bf16.msra.mxu1 %v5877_v37  ;;  %5872 = vmatprep.subr.bf16.mxu0 %v5871_v38  ;;  %v98_v37 = vld [vmem:[#allocation6 + $0x120] sm:$0xff]  ;;  %v5939_v1 = vpack.c.bf16 %v169_v57, %v105_v56  ;;  %v168_v2 = vld [vmem:[#allocation6 + $0x350] sm:$0xff]  ;;  %v233_v5 = vld [vmem:[#allocation6 + $0x558] sm:$0xff] }
  0x5d   :  { %5880 = vmatprep.subr.bf16.mxu1 %v5879_v42  ;;  %1239 = vmatprep.mubr.f32.mxu0 %v6111_v0  ;;  %v162_v38 = vld [vmem:[#allocation6 + $0x320] sm:$0xff]  ;;  %v227_v42 = vld [vmem:[#allocation6 + $0x528] sm:$0xff]  ;;  %v297_v6 = vld [vmem:[#allocation6 + $0x758] sm:$0xff]  ;;  %v5941_v8 = vpack.c.bf16 %v168_v2, %v104_v63 }
  0x5e   :  { %1310 = vmatprep.mubr.f32.mxu1 %v6111_v0  ;;  %v5917_v46 = vpack.c.bf16 %v162_v38, %v98_v37  ;;  %v232_v12 = vld [vmem:[#allocation6 + $0x550] sm:$0xff]  ;;  %v5943_v13 = vpack.c.bf16 %v297_v6, %v233_v5  ;;  %v171_v16 = vld [vmem:[#allocation6 + $0x368] sm:$0xff]  ;;  %v109_v17 = vld [vmem:[#allocation6 + $0x178] sm:$0xff] }
  0x5f   :  { %5874 = vmatpush1.bf16.msra.mxu0 %v5873_v48  ;;  %v5919_v48 = vpack.c.bf16 %v291_v43, %v227_v42  ;;  %v296_v14 = vld [vmem:[#allocation6 + $0x750] sm:$0xff]  ;;  %v173_v18 = vld [vmem:[#allocation6 + $0x378] sm:$0xff]  ;;  %v299_v29 = vld [vmem:[#allocation6 + $0x768] sm:$0xff] }
  0x60   :  { %5882 = vmatpush1.bf16.msra.mxu1 %v5881_v49  ;;  %5884 = vmatprep.subr.bf16.mxu0 %v5883_v50  ;;  %v226_v49 = vld [vmem:[#allocation6 + $0x520] sm:$0xff]  ;;  %v5945_v20 = vpack.c.bf16 %v296_v14, %v232_v12  ;;  %v108_v24 = vld [vmem:[#allocation6 + $0x170] sm:$0xff]  ;;  %v5955_v25 = vpack.c.bf16 %v173_v18, %v109_v17  ;;  %v237_v30 = vld [vmem:[#allocation6 + $0x578] sm:$0xff] }
  0x61   :  { %5892 = vmatprep.subr.bf16.mxu1 %v5891_v54  ;;  %v290_v50 = vld [vmem:[#allocation6 + $0x720] sm:$0xff]  ;;  %v103_v54 = vld [vmem:[#allocation6 + $0x148] sm:$0xff]  ;;  %v172_v27 = vld [vmem:[#allocation6 + $0x370] sm:$0xff] }
  0x62   :  { %5623 = vmatmul.mubr.msk.f32.vlgmr.msra.gmra.mrb[12].mxu0 %vm319_vm0, %v6176_v26  ;;  %v5921_v58 = vpack.c.bf16 %v290_v50, %v226_v49  ;;  %v301_v31 = vld [vmem:[#allocation6 + $0x778] sm:$0xff]  ;;  %v5957_v33 = vpack.c.bf16 %v172_v27, %v108_v24  ;;  %v236_v37 = vld [vmem:[#allocation6 + $0x570] sm:$0xff]  ;;  %v175_v41 = vld [vmem:[#allocation6 + $0x388] sm:$0xff] }
  0x63   :  { %5624 = vmatmul.mubr.msk.f32.vlgmr.msra.gmra.mrb[12].mxu1 %vm319_vm0, %v6176_v26  ;;  %5886 = vmatpush1.bf16.msra.mxu0 %v5885_v60  ;;  %v5931_v60 = vpack.c.bf16 %v167_v55, %v103_v54  ;;  %v5959_v38 = vpack.c.bf16 %v301_v31, %v237_v30  ;;  %v300_v39 = vld [vmem:[#allocation6 + $0x770] sm:$0xff]  ;;  %v113_v42 = vld [vmem:[#allocation6 + $0x198] sm:$0xff]  ;;  %v303_v53 = vld [vmem:[#allocation6 + $0x788] sm:$0xff] }
  0x64   :  { %5894 = vmatpush1.bf16.msra.mxu1 %v5893_v61  ;;  %5888 = vmatprep.subr.bf16.mxu0 %v5887_v62  ;;  %v102_v61 = vld [vmem:[#allocation6 + $0x140] sm:$0xff]  ;;  %v177_v43 = vld [vmem:[#allocation6 + $0x398] sm:$0xff]  ;;  %v5961_v45 = vpack.c.bf16 %v300_v39, %v236_v37  ;;  %v112_v49 = vld [vmem:[#allocation6 + $0x190] sm:$0xff] }
  0x65   :  { %5896 = vmatprep.subr.bf16.mxu1 %v5895_v3  ;;  %1381 = vmatprep.mubr.f32.mxu0 %v6111_v0  ;;  %v166_v62 = vld [vmem:[#allocation6 + $0x340] sm:$0xff]  ;;  %v231_v3 = vld [vmem:[#allocation6 + $0x548] sm:$0xff]  ;;  %v5971_v50 = vpack.c.bf16 %v177_v43, %v113_v42  ;;  %v176_v51 = vld [vmem:[#allocation6 + $0x390] sm:$0xff] }
  0x66   :  { %1452 = vmatprep.mubr.f32.mxu1 %v6111_v0  ;;  %v5933_v7 = vpack.c.bf16 %v166_v62, %v102_v61  ;;  %v241_v54 = vld [vmem:[#allocation6 + $0x598] sm:$0xff]  ;;  %v5973_v57 = vpack.c.bf16 %v176_v51, %v112_v49  ;;  %v240_v61 = vld [vmem:[#allocation6 + $0x590] sm:$0xff]  ;;  %v179_v2 = vld [vmem:[#allocation6 + $0x3a8] sm:$0xff] }
  0x67   :  { %5890 = vmatpush1.bf16.msra.mxu0 %v5889_v9  ;;  %v5935_v9 = vpack.c.bf16 %v295_v4, %v231_v3  ;;  %v305_v55 = vld [vmem:[#allocation6 + $0x798] sm:$0xff]  ;;  %v304_v63 = vld [vmem:[#allocation6 + $0x790] sm:$0xff]  ;;  %v307_v14 = vld [vmem:[#allocation6 + $0x7a8] sm:$0xff] }
  0x68   :  { %5898 = vmatpush1.bf16.msra.mxu1 %v5897_v10  ;;  %5900 = vmatprep.subr.bf16.mxu0 %v5899_v11  ;;  %v230_v10 = vld [vmem:[#allocation6 + $0x540] sm:$0xff]  ;;  %v5975_v62 = vpack.c.bf16 %v305_v55, %v241_v54  ;;  %v117_v3 = vld [vmem:[#allocation6 + $0x1b8] sm:$0xff]  ;;  %v5977_v6 = vpack.c.bf16 %v304_v63, %v240_v61  ;;  %v180_v12 = vld [vmem:[#allocation6 + $0x3b0] sm:$0xff] }
  0x69   :  { %5908 = vmatprep.subr.bf16.mxu1 %v5907_v15  ;;  %v294_v11 = vld [vmem:[#allocation6 + $0x740] sm:$0xff]  ;;  %v107_v15 = vld [vmem:[#allocation6 + $0x168] sm:$0xff]  ;;  %v181_v4 = vld [vmem:[#allocation6 + $0x3b8] sm:$0xff] }
  0x6a   :  { %5625 = vmatmul.mubr.msk.f32.vlgmr.msra.gmra.mrb[14].mxu0 %vm319_vm0, %v6176_v26  ;;  %v5937_v19 = vpack.c.bf16 %v294_v11, %v230_v10  ;;  %v116_v10 = vld [vmem:[#allocation6 + $0x1b0] sm:$0xff]  ;;  %v5987_v11 = vpack.c.bf16 %v181_v4, %v117_v3  ;;  %v183_v27 = vld [vmem:[#allocation6 + $0x3c8] sm:$0xff]  ;;  %v185_v30 = vld [vmem:[#allocation6 + $0x3d8] sm:$0xff] }
  0x6b   :  { %5626 = vmatmul.mubr.msk.f32.vlgmr.msra.gmra.mrb[14].mxu1 %vm319_vm0, %v6176_v26  ;;  %5902 = vmatpush1.bf16.msra.mxu0 %v5901_v21  ;;  %v5947_v21 = vpack.c.bf16 %v171_v16, %v107_v15  ;;  %v245_v15 = vld [vmem:[#allocation6 + $0x5b8] sm:$0xff]  ;;  %v5989_v18 = vpack.c.bf16 %v180_v12, %v116_v10  ;;  %v308_v24 = vld [vmem:[#allocation6 + $0x7b0] sm:$0xff]  ;;  %v247_v39 = vld [vmem:[#allocation6 + $0x5c8] sm:$0xff] }
  0x6c   :  { %5910 = vmatpush1.bf16.msra.mxu1 %v5909_v22  ;;  %5904 = vmatprep.subr.bf16.mxu0 %v5903_v23  ;;  %v106_v22 = vld [vmem:[#allocation6 + $0x160] sm:$0xff]  ;;  %v309_v16 = vld [vmem:[#allocation6 + $0x7b8] sm:$0xff]  ;;  %v187_v54 = vld [vmem:[#allocation6 + $0x3e8] sm:$0xff] }
  0x6d   :  { %5912 = vmatprep.subr.bf16.mxu1 %v5911_v28  ;;  %1523 = vmatprep.mubr.f32.mxu0 %v6111_v0  ;;  %v170_v23 = vld [vmem:[#allocation6 + $0x360] sm:$0xff]  ;;  %v235_v28 = vld [vmem:[#allocation6 + $0x568] sm:$0xff]  ;;  %v249_v42 = vld [vmem:[#allocation6 + $0x5d8] sm:$0xff] }
  0x6e   :  { %1594 = vmatprep.mubr.f32.mxu1 %v6111_v0  ;;  %v5949_v32 = vpack.c.bf16 %v170_v23, %v106_v22  ;;  %v244_v22 = vld [vmem:[#allocation6 + $0x5b0] sm:$0xff]  ;;  %v5991_v23 = vpack.c.bf16 %v309_v16, %v245_v15  ;;  %v313_v43 = vld [vmem:[#allocation6 + $0x7d8] sm:$0xff]  ;;  %v310_v49 = vld [vmem:[#allocation6 + $0x7c0] sm:$0xff] }
  0x6f   :  { %5906 = vmatpush1.bf16.msra.mxu0 %v5905_v34  ;;  %v5951_v34 = vpack.c.bf16 %v299_v29, %v235_v28  ;;  %v2635_v28 = vlaneseq  ;;  %v121_v29 = vld [vmem:[#allocation6 + $0x1d8] sm:$0xff]  ;;  %v6007_v51 = vpack.c.bf16 %v313_v43, %v249_v42  ;;  %v122_v63 = vld [vmem:[#allocation6 + $0x1e0] sm:$0xff]  ;;  %v188_v4 = vld [vmem:[#allocation6 + $0x3f0] sm:$0xff] }
  0x70   :  { %5914 = vmatpush1.bf16.msra.mxu1 %v5913_v35  ;;  %5916 = vmatprep.subr.bf16.mxu0 %v5915_v36  ;;  %v234_v35 = vld [vmem:[#allocation6 + $0x560] sm:$0xff]  ;;  %v6003_v37 = vpack.c.bf16 %v185_v30, %v121_v29 }
  0x71   :  { %5924 = vmatprep.subr.bf16.mxu1 %v5923_v40  ;;  %v298_v36 = vld [vmem:[#allocation6 + $0x760] sm:$0xff]  ;;  %v111_v40 = vld [vmem:[#allocation6 + $0x188] sm:$0xff] }
  0x72   :  { %5627 = vmatmul.mubr.msk.f32.vlgmr.msra.gmra.mrb[16].mxu0 %vm319_vm0, %v6176_v26  ;;  %v5953_v44 = vpack.c.bf16 %v298_v36, %v234_v35  ;;  %v182_v35 = vld [vmem:[#allocation6 + $0x3c0] sm:$0xff]  ;;  %v120_v36 = vld [vmem:[#allocation6 + $0x1d0] sm:$0xff] }
  0x73   :  { %5628 = vmatmul.mubr.msk.f32.vlgmr.msra.gmra.mrb[16].mxu1 %vm319_vm0, %v6176_v26  ;;  %5918 = vmatpush1.bf16.msra.mxu0 %v5917_v46  ;;  %v5963_v46 = vpack.c.bf16 %v175_v41, %v111_v40  ;;  %v311_v40 = vld [vmem:[#allocation6 + $0x7c8] sm:$0xff]  ;;  %v6255_v41 = vshrl.u32 %v2635_v28, 7  ;;  %v314_v15 = vld [vmem:[#allocation6 + $0x7e0] sm:$0xff] }
  0x74   :  { %5926 = vmatpush1.bf16.msra.mxu1 %v5925_v47  ;;  %5920 = vmatprep.subr.bf16.mxu0 %v5919_v48  ;;  %v110_v47 = vld [vmem:[#allocation6 + $0x180] sm:$0xff] }
  0x75   :  { %5928 = vmatprep.subr.bf16.mxu1 %v5927_v52  ;;  %1665 = vmatprep.mubr.f32.mxu0 %v6111_v0  ;;  %v174_v48 = vld [vmem:[#allocation6 + $0x380] sm:$0xff]  ;;  %v239_v52 = vld [vmem:[#allocation6 + $0x588] sm:$0xff] }
  0x76   :  { %1736 = vmatprep.mubr.f32.mxu1 %v6111_v0  ;;  %v5965_v56 = vpack.c.bf16 %v174_v48, %v110_v47  ;;  %v5999_v47 = vpack.c.bf16 %v311_v40, %v247_v39  ;;  %v246_v48 = vld [vmem:[#allocation6 + $0x5c0] sm:$0xff] }
  0x77   :  { %5922 = vmatpush1.bf16.msra.mxu0 %v5921_v58  ;;  %v5967_v58 = vpack.c.bf16 %v303_v53, %v239_v52  ;;  %v312_v52 = vld [vmem:[#allocation6 + $0x7d0] sm:$0xff]  ;;  %v123_v53 = vld [vmem:[#allocation6 + $0x1e8] sm:$0xff] }
  0x78   :  { %5930 = vmatpush1.bf16.msra.mxu1 %v5929_v59  ;;  %5932 = vmatprep.subr.bf16.mxu0 %v5931_v60  ;;  %v238_v59 = vld [vmem:[#allocation6 + $0x580] sm:$0xff] }
  0x79   :  { %5940 = vmatprep.subr.bf16.mxu1 %v5939_v1  ;;  %v302_v60 = vld [vmem:[#allocation6 + $0x780] sm:$0xff]  ;;  %v115_v1 = vld [vmem:[#allocation6 + $0x1a8] sm:$0xff] }
  0x7a   :  { %5629 = vmatmul.mubr.msk.f32.vlgmr.msra.gmra.mrb[18].mxu0 %vm319_vm0, %v6176_v26  ;;  %v5969_v5 = vpack.c.bf16 %v302_v60, %v238_v59  ;;  %v6001_v60 = vpack.c.bf16 %v310_v49, %v246_v48 }
  0x7b   :  { %5630 = vmatmul.mubr.msk.f32.vlgmr.msra.gmra.mrb[18].mxu1 %vm319_vm0, %v6176_v26  ;;  %5934 = vmatpush1.bf16.msra.mxu0 %v5933_v7  ;;  %v5979_v7 = vpack.c.bf16 %v179_v2, %v115_v1  ;;  %v186_v1 = vld [vmem:[#allocation6 + $0x3e0] sm:$0xff]  ;;  %v124_v2 = vld [vmem:[#allocation6 + $0x1f0] sm:$0xff] }
  0x7c   :  { %5942 = vmatpush1.bf16.msra.mxu1 %v5941_v8  ;;  %5936 = vmatprep.subr.bf16.mxu0 %v5935_v9  ;;  %v114_v8 = vld [vmem:[#allocation6 + $0x1a0] sm:$0xff]  ;;  %v6021_v12 = vpack.c.bf16 %v188_v4, %v124_v2 }
  0x7d   :  { %5944 = vmatprep.subr.bf16.mxu1 %v5943_v13  ;;  %1807 = vmatprep.mubr.f32.mxu0 %v6111_v0  ;;  %v178_v9 = vld [vmem:[#allocation6 + $0x3a0] sm:$0xff]  ;;  %v243_v13 = vld [vmem:[#allocation6 + $0x5a8] sm:$0xff] }
  0x7e   :  { %1878 = vmatprep.mubr.f32.mxu1 %v6111_v0  ;;  %v5981_v17 = vpack.c.bf16 %v178_v9, %v114_v8  ;;  %v253_v8 = vld [vmem:[#allocation6 + $0x5f8] sm:$0xff] }
  0x7f   :  { %5938 = vmatpush1.bf16.msra.mxu0 %v5937_v19  ;;  %v5983_v19 = vpack.c.bf16 %v307_v14, %v243_v13  ;;  %v317_v9 = vld [vmem:[#allocation6 + $0x7f8] sm:$0xff]  ;;  %v250_v14 = vld [vmem:[#allocation6 + $0x5e0] sm:$0xff] }
  0x80   :  { %5946 = vmatpush1.bf16.msra.mxu1 %v5945_v20  ;;  %5948 = vmatprep.subr.bf16.mxu0 %v5947_v21  ;;  %v242_v20 = vld [vmem:[#allocation6 + $0x5a0] sm:$0xff]  ;;  %v6023_v16 = vpack.c.bf16 %v317_v9, %v253_v8 }
  0x81   :  { %5956 = vmatprep.subr.bf16.mxu1 %v5955_v25  ;;  %v306_v21 = vld [vmem:[#allocation6 + $0x7a0] sm:$0xff]  ;;  %v119_v25 = vld [vmem:[#allocation6 + $0x1c8] sm:$0xff] }
  0x82   :  { %5631 = vmatmul.mubr.msk.f32.vlgmr.msra.gmra.mrb[20].mxu0 %vm319_vm0, %v6176_v26  ;;  %v5985_v31 = vpack.c.bf16 %v306_v21, %v242_v20  ;;  %v6034_v20 = vld [vmem:[%s6594_s2] sm:$0x1] }
  0x83   :  { %5632 = vmatmul.mubr.msk.f32.vlgmr.msra.gmra.mrb[20].mxu1 %vm319_vm0, %v6176_v26  ;;  %5950 = vmatpush1.bf16.msra.mxu0 %v5949_v32  ;;  %v5993_v32 = vpack.c.bf16 %v308_v24, %v244_v22 }
  0x84   :  { %5958 = vmatpush1.bf16.msra.mxu1 %v5957_v33  ;;  %5952 = vmatprep.subr.bf16.mxu0 %v5951_v34  ;;  %v5995_v33 = vpack.c.bf16 %v183_v27, %v119_v25  ;;  %v118_v34 = vld [vmem:[#allocation6 + $0x1c0] sm:$0xff] }
  0x85   :  { %5960 = vmatprep.subr.bf16.mxu1 %v5959_v38  ;;  %1949 = vmatprep.mubr.f32.mxu0 %v6111_v0  ;;  %v184_v38 = vld [vmem:[#allocation6 + $0x3d0] sm:$0xff] }
  0x86   :  { %2020 = vmatprep.mubr.f32.mxu1 %v6111_v0 }
  0x87   :  { %5954 = vmatpush1.bf16.msra.mxu0 %v5953_v44  ;;  %v6258_v44 = vld [vmem:[#allocation3] sm:$0xff] }
  0x88   :  { %5962 = vmatpush1.bf16.msra.mxu1 %v5961_v45  ;;  %5964 = vmatprep.subr.bf16.mxu0 %v5963_v46  ;;  %v5997_v45 = vpack.c.bf16 %v182_v35, %v118_v34  ;;  %v6005_v46 = vpack.c.bf16 %v184_v38, %v120_v36  ;;  %v2603_v55 = vunpack.c.0.s8 %v6258_v44  ;;  %v2604_v59 = vunpack.c.1.s8 %v6258_v44  ;;  %v2596_v35 = vld [vmem:[#allocation3 + $0x8] sm:$0xff] }
  0x89   :  { %5972 = vmatprep.subr.bf16.mxu1 %v5971_v50  ;;  %v248_v50 = vld [vmem:[#allocation6 + $0x5d0] sm:$0xff]  ;;  %v2605_v22 = vunpack.c.2.s8 %v6258_v44  ;;  %v2606_v24 = vunpack.c.3.s8 %v6258_v44  ;;  %v2607_v36 = vunpack.c.0.s8 %v2596_v35  ;;  %v2610_v48 = vunpack.c.3.s8 %v2596_v35 }
  0x8a   :  { %5633 = vmatmul.mubr.msk.f32.vlgmr.msra.gmra.mrb[22].mxu0 %vm319_vm0, %v6176_v26  ;;  %v6009_v61 = vpack.c.bf16 %v312_v52, %v248_v50 }
  0x8b   :  { %5634 = vmatmul.mubr.msk.f32.vlgmr.msra.gmra.mrb[22].mxu1 %vm319_vm0, %v6176_v26  ;;  %5966 = vmatpush1.bf16.msra.mxu0 %v5965_v56  ;;  %v6262_v56 = vsub.s32 4, %v6255_v41 }
  0x8c   :  { %5974 = vmatpush1.bf16.msra.mxu1 %v5973_v57  ;;  %5968 = vmatprep.subr.bf16.mxu0 %v5967_v58  ;;  %v125_v57 = vld [vmem:[#allocation6 + $0x1f8] sm:$0xff] }
  0x8d   :  { %5976 = vmatprep.subr.bf16.mxu1 %v5975_v62  ;;  %2091 = vmatprep.mubr.f32.mxu0 %v6111_v0  ;;  %v189_v58 = vld [vmem:[#allocation6 + $0x3f8] sm:$0xff]  ;;  %v6011_v62 = vpack.c.bf16 %v187_v54, %v123_v53  ;;  %v2652_v10 = vrot.slane %v2604_v59, %v6262_v56  ;;  %v2660_v29 = vrot.slane %v2605_v22, %v6262_v56 }
  0x8e   :  { %2162 = vmatprep.mubr.f32.mxu1 %v6111_v0  ;;  %v6019_v3 = vpack.c.bf16 %v189_v58, %v125_v57  ;;  %v2668_v30 = vrot.slane %v2606_v24, %v6262_v56  ;;  %v2676_v40 = vrot.slane %v2607_v36, %v6262_v56  ;;  %v2700_v57 = vrot.slane %v2610_v48, %v6262_v56  ;;  %v6325_v58 = vld [vmem:[#allocation3 + $0x10] sm:$0xff] }
  0x8f   :  { %5970 = vmatpush1.bf16.msra.mxu0 %v5969_v5  ;;  %v251_v5 = vld [vmem:[#allocation6 + $0x5e8] sm:$0xff] }
  0x90   :  { %5978 = vmatpush1.bf16.msra.mxu1 %v5977_v6  ;;  %5980 = vmatprep.subr.bf16.mxu0 %v5979_v7  ;;  %v315_v6 = vld [vmem:[#allocation6 + $0x7e8] sm:$0xff]  ;;  %v6271_v7 = vsub.s32 0, %v6255_v41 }
  0x91   :  { %5988 = vmatprep.subr.bf16.mxu1 %v5987_v11  ;;  %v6013_v11 = vpack.c.bf16 %v186_v1, %v122_v63  ;;  %v6015_v13 = vpack.c.bf16 %v315_v6, %v251_v5  ;;  %v2612_v1 = vunpack.c.1.s8 %v6325_v58 }
  0x92   :  { %5635 = vmatmul.mubr.msk.f32.vlgmr.msra.gmra.mrb[24].mxu0 %vm319_vm0, %v6176_v26  ;;  %v2908_v21 = vrot.slane %v2652_v10, %v6271_v7  ;;  %v2640_v27 = vrot.slane %v2603_v55, %v6271_v7  ;;  %v2648_v28 = vrot.slane %v2604_v59, %v6271_v7  ;;  %v2924_v34 = vrot.slane %v2668_v30, %v6271_v7 }
  0x93   :  { %5636 = vmatmul.mubr.msk.f32.vlgmr.msra.gmra.mrb[24].mxu1 %vm319_vm0, %v6176_v26  ;;  %5982 = vmatpush1.bf16.msra.mxu0 %v5981_v17  ;;  %v252_v17 = vld [vmem:[#allocation6 + $0x5f0] sm:$0xff]  ;;  %v2656_v38 = vrot.slane %v2605_v22, %v6271_v7  ;;  %v2664_v39 = vrot.slane %v2606_v24, %v6271_v7  ;;  %v2672_v52 = vrot.slane %v2607_v36, %v6271_v7  ;;  %v6363_v24 = vld [vmem:[#allocation3 + $0x18] sm:$0xff] }
  0x94   :  { %5990 = vmatpush1.bf16.msra.mxu1 %v5989_v18  ;;  %5984 = vmatprep.subr.bf16.mxu0 %v5983_v19  ;;  %v316_v18 = vld [vmem:[#allocation6 + $0x7f0] sm:$0xff]  ;;  %vm3152_vm2 = vcmp.eq.s32.totalorder %v6255_v41, %v2908_v21  ;;  %vm3156_vm6 = vcmp.eq.s32.totalorder %v6255_v41, %v2924_v34  ;;  %v2956_v63 = vrot.slane %v2700_v57, %v6271_v7 }
  0x95   :  { %5992 = vmatprep.subr.bf16.mxu1 %v5991_v23  ;;  %2233 = vmatprep.mubr.f32.mxu0 %v6111_v0  ;;  %v6017_v23 = vpack.c.bf16 %v314_v15, %v250_v14  ;;  %v6025_v25 = vpack.c.bf16 %v316_v18, %v252_v17  ;;  %v2912_v43 = vrot.slane %v2656_v38, %v6271_v7  ;;  %v2614_v15 = vunpack.c.3.s8 %v6325_v58 }
  0x96   :  { %2304 = vmatprep.mubr.f32.mxu1 %v6111_v0  ;;  %v2920_v44 = vrot.slane %v2664_v39, %v6271_v7  ;;  %v2928_v59 = vrot.slane %v2672_v52, %v6271_v7  ;;  %vm3164_vm14 = vcmp.eq.s32.totalorder %v6255_v41, %v2956_v63  ;;  %v2716_v9 = vrot.slane %v2612_v1, %v6262_v56 }
  0x97   :  { %5986 = vmatpush1.bf16.msra.mxu0 %v5985_v31  ;;  %v6112_v31 = vmov 1.0   ;;  %vm3153_vm7 = vcmp.eq.s32.totalorder %v6255_v41, %v2912_v43  ;;  %v2712_v21 = vrot.slane %v2612_v1, %v6271_v7 }
  0x98   :  { %5994 = vmatpush1.bf16.msra.mxu1 %v5993_v32  ;;  %5996 = vmatprep.subr.bf16.mxu0 %v5995_v33  ;;  %v2896_v32 = vrot.slane %v2640_v27, %v6271_v7  ;;  %v2916_v33 = vrot.slane %v2660_v29, %v6271_v7  ;;  %vm3155_vm8 = vcmp.eq.s32.totalorder %v6255_v41, %v2920_v44  ;;  %v2615_v29 = vunpack.c.0.s8 %v6363_v24 }
  0x99   :  { %6004 = vmatprep.subr.bf16.mxu1 %v6003_v37  ;;  %v2608_v37 = vunpack.c.1.s8 %v2596_v35  ;;  %vm3157_vm11 = vcmp.eq.s32.totalorder %v6255_v41, %v2928_v59  ;;  %v2972_v14 = vrot.slane %v2716_v9, %v6271_v7  ;;  %v2968_v27 = vrot.slane %v2712_v21, %v6271_v7 }
  0x9a   :  { %5637 = vmatmul.mubr.msk.f32.vlgmr.msra.gmra.mrb[26].mxu0 %vm319_vm0, %v6176_v26  ;;  %vm3149_vm3 = vcmp.eq.s32.totalorder %v6255_v41, %v2896_v32  ;;  %vm3154_vm5 = vcmp.eq.s32.totalorder %v6255_v41, %v2916_v33  ;;  %v2616_v32 = vunpack.c.1.s8 %v6363_v24  ;;  %v2740_v38 = vrot.slane %v2615_v29, %v6262_v56 }
  0x9b   :  { %5638 = vmatmul.mubr.msk.f32.vlgmr.msra.gmra.mrb[26].mxu1 %vm319_vm0, %v6176_v26  ;;  %5998 = vmatpush1.bf16.msra.mxu0 %v5997_v45  ;;  %v2644_v26 = vrot.slane %v2603_v55, %v6262_v56  ;;  %v2684_v42 = vrot.slane %v2608_v37, %v6262_v56  ;;  %v2932_v45 = vrot.slane %v2676_v40, %v6271_v7  ;;  %v2617_v44 = vunpack.c.2.s8 %v6363_v24 }
  0x9c   :  { %6006 = vmatpush1.bf16.msra.mxu1 %v6005_v46  ;;  %6000 = vmatprep.subr.bf16.mxu0 %v5999_v47  ;;  %v2609_v46 = vunpack.c.2.s8 %v2596_v35  ;;  %v2680_v54 = vrot.slane %v2608_v37, %v6271_v7  ;;  %v2728_v37 = vrot.slane %v2614_v15, %v6271_v7  ;;  %v2748_v39 = vrot.slane %v2616_v32, %v6262_v56 }
  0x9d   :  { %6008 = vmatprep.subr.bf16.mxu1 %v6007_v51  ;;  %2375 = vmatprep.mubr.f32.mxu0 %v6111_v0  ;;  %v2900_v19 = vrot.slane %v2644_v26, %v6271_v7  ;;  %v2940_v47 = vrot.slane %v2684_v42, %v6271_v7  ;;  %vm3158_vm9 = vcmp.eq.s32.totalorder %v6255_v41, %v2932_v45 }
  0x9e   :  { %2446 = vmatprep.mubr.f32.mxu1 %v6111_v0  ;;  %v2692_v55 = vrot.slane %v2609_v46, %v6262_v56  ;;  %v2688_v5 = vrot.slane %v2609_v46, %v6271_v7  ;;  %v2696_v26 = vrot.slane %v2610_v48, %v6271_v7  ;;  %v2984_v42 = vrot.slane %v2728_v37, %v6271_v7 }
  0x9f   :  { %6002 = vmatpush1.bf16.msra.mxu0 %v6001_v60  ;;  %vm3150_vm1 = vcmp.eq.s32.totalorder %v6255_v41, %v2900_v19  ;;  %vm3160_vm10 = vcmp.eq.s32.totalorder %v6255_v41, %v2940_v47  ;;  %v2936_v60 = vrot.slane %v2680_v54, %v6271_v7  ;;  %v2996_v43 = vrot.slane %v2740_v38, %v6271_v7 }
  0xa0   :  { %6010 = vmatpush1.bf16.msra.mxu1 %v6009_v61  ;;  %6012 = vmatprep.subr.bf16.mxu0 %v6011_v62  ;;  %v2948_v61 = vrot.slane %v2692_v55, %v6271_v7  ;;  %v2611_v62 = vunpack.c.0.s8 %v6325_v58  ;;  %v2944_v10 = vrot.slane %v2688_v5, %v6271_v7  ;;  %v3004_v45 = vrot.slane %v2748_v39, %v6271_v7  ;;  %v6401_v55 = vld [vmem:[#allocation3 + $0x20] sm:$0xff] }
  0xa1   :  { %6020 = vmatprep.subr.bf16.mxu1 %v6019_v3  ;;  %vm3159_vm12 = vcmp.eq.s32.totalorder %v6255_v41, %v2936_v60  ;;  %v2618_v46 = vunpack.c.3.s8 %v6363_v24  ;;  %v2744_v52 = vrot.slane %v2616_v32, %v6271_v7  ;;  %v2619_v60 = vunpack.c.0.s8 %v6401_v55 }
  0xa2   :  { %5639 = vmatmul.mubr.msk.f32.vlgmr.msra.gmra.mrb[28].mxu0 %vm319_vm0, %v6034_v20  ;;  %vm3162_vm13 = vcmp.eq.s32.totalorder %v6255_v41, %v2948_v61  ;;  %v2708_v8 = vrot.slane %v2611_v62, %v6262_v56  ;;  %vm3161_vm15 = vcmp.eq.s32.totalorder %v6255_v41, %v2944_v10  ;;  %v2704_v19 = vrot.slane %v2611_v62, %v6271_v7 }
  0xa3   :  { %5640 = vmatmul.mubr.msk.f32.vlgmr.msra.gmra.mrb[28].mxu1 %vm319_vm0, %v6034_v20  ;;  %6014 = vmatpush1.bf16.msra.mxu0 %v6013_v11  ;;  %v2952_v11 = vrot.slane %v2696_v26, %v6271_v7  ;;  %v2764_v54 = vrot.slane %v2618_v46, %v6262_v56  ;;  %v2620_v62 = vunpack.c.1.s8 %v6401_v55  ;;  %v2760_v5 = vrot.slane %v2618_v46, %v6271_v7 }
  0xa4   :  { %6022 = vmatpush1.bf16.msra.mxu1 %v6021_v12  ;;  %6016 = vmatprep.subr.bf16.mxu0 %v6015_v13  ;;  %v2964_v12 = vrot.slane %v2708_v8, %v6271_v7  ;;  %v2613_v13 = vunpack.c.2.s8 %v6325_v58  ;;  %v3000_v58 = vrot.slane %v2744_v52, %v6271_v7 }
  0xa5   :  { %6024 = vmatprep.subr.bf16.mxu1 %v6023_v16  ;;  %2517 = vmatprep.mubr.f32.mxu0 %v6111_v0  ;;  %v3020_v61 = vrot.slane %v2764_v54, %v6271_v7  ;;  %v2780_v26 = vrot.slane %v2620_v62, %v6262_v56  ;;  %v3016_v9 = vrot.slane %v2760_v5, %v6271_v7 }
  0xa6   :  { %2588 = vmatprep.mubr.f32.mxu1 %v6111_v0  ;;  %v2904_v0 = vrot.slane %v2648_v28, %v6271_v7  ;;  %v2724_v22 = vrot.slane %v2613_v13, %v6262_v56  ;;  %v2720_v35 = vrot.slane %v2613_v13, %v6271_v7  ;;  %v2622_v13 = vunpack.c.3.s8 %v6401_v55 }
  0xa7   :  { %6018 = vmatpush1.bf16.msra.mxu0 %v6017_v23  ;;  %v2732_v23 = vrot.slane %v2614_v15, %v6262_v56 }
  0xa8   :  { %6026 = vmatpush1.bf16.msra.mxu1 %v6025_v25  ;;  %5707 = vmatprep.subr.msk.mxu0 %vm3150_vm1, %v6112_v31  ;;  %vm3151_vm4 = vcmp.eq.s32.totalorder %v6255_v41, %v2904_v0  ;;  %vm3166_vm1 = vcmp.eq.s32.totalorder %v6255_v41, %v2964_v12  ;;  %v2960_v25 = vrot.slane %v2704_v19, %v6271_v7 }
  0xa9   :  { %5709 = vmatprep.subr.msk.mxu1 %vm3152_vm2, %v6112_v31  ;;  %vm3168_vm2 = vcmp.eq.s32.totalorder %v6255_v41, %v2972_v14  ;;  %v2980_v28 = vrot.slane %v2724_v22, %v6271_v7  ;;  %v2988_v30 = vrot.slane %v2732_v23, %v6271_v7  ;;  %v2976_v40 = vrot.slane %v2720_v35, %v6271_v7  ;;  %v6439_v22 = vld [vmem:[#allocation3 + $0x28] sm:$0xff] }
  0xaa   :  { %5641 = vmatmul.mubr.msk.f32.vlgmr.msra.gmra.mrb[30].mxu0 %vm319_vm0, %v6034_v20  ;;  %v3036_v12 = vrot.slane %v2780_v26, %v6271_v7  ;;  %v2776_v19 = vrot.slane %v2620_v62, %v6271_v7  ;;  %v2796_v21 = vrot.slane %v2622_v13, %v6262_v56  ;;  %v2792_v35 = vrot.slane %v2622_v13, %v6271_v7 }
  0xab   :  { %5642 = vmatmul.mubr.msk.f32.vlgmr.msra.gmra.mrb[30].mxu1 %vm319_vm0, %v6034_v20  ;;  %vm3163_vm0 = vcmp.eq.s32.totalorder %v6255_v41, %v2952_v11  ;;  %v2621_v11 = vunpack.c.2.s8 %v6401_v55 }
  0xac   :  { %v3032_v24 = vrot.slane %v2776_v19, %v6271_v7  ;;  %v3048_v39 = vrot.slane %v2792_v35, %v6271_v7 }
  0xb0   :  { %5708 = vmatpush1.xpose.msk.msra.mxu0 %vm3149_vm3, %v6112_v31  ;;  %vm3165_vm3 = vcmp.eq.s32.totalorder %v6255_v41, %v2960_v25 }
  0xb1   :  { %5710 = vmatpush1.xpose.msk.msra.mxu1 %vm3151_vm4, %v6112_v31  ;;  %5711 = vmatprep.subr.msk.mxu0 %vm3154_vm5, %v6112_v31  ;;  %vm3167_vm4 = vcmp.eq.s32.totalorder %v6255_v41, %v2968_v27  ;;  %vm3170_vm5 = vcmp.eq.s32.totalorder %v6255_v41, %v2980_v28  ;;  %v2623_v27 = vunpack.c.0.s8 %v6439_v22  ;;  %v3052_v28 = vrot.slane %v2796_v21, %v6271_v7 }
  0xb2   :  { %5713 = vmatprep.subr.msk.mxu1 %vm3156_vm6, %v6112_v31  ;;  %vm3172_vm6 = vcmp.eq.s32.totalorder %v6255_v41, %v2988_v30 }
 0x105   :  { %v389_v49 = vpop.f32.mrb[0].mxu0 }
 0x106   :  { %v460_v50 = vpop.f32.mrb[0].mxu1  ;;  %v391_v51 = vpop.f32.mrb[1].mxu0 }
 0x107   :  { %v462_v53 = vpop.f32.mrb[1].mxu1  ;;  %3405 = vmatprep.mubr.f32.mxu0 %v391_v51 }
 0x108   :  { %3475 = vmatprep.mubr.f32.mxu1 %v462_v53  ;;  %3406 = vmatmul.mubr.f32.vlgmr.msra.gmra.mrb[32].mxu0 %v389_v49  ;;  %v2756_v53 = vrot.slane %v2617_v44, %v6262_v56 }
 0x109   :  { %3476 = vmatmul.mubr.f32.vlgmr.msra.gmra.mrb[32].mxu1 %v460_v50  ;;  %5712 = vmatpush1.xpose.msk.msra.mxu0 %vm3153_vm7, %v6112_v31  ;;  %vm3169_vm7 = vcmp.eq.s32.totalorder %v6255_v41, %v2976_v40  ;;  %v2736_v50 = vrot.slane %v2615_v29, %v6271_v7  ;;  %v2624_v29 = vunpack.c.1.s8 %v6439_v22 }
 0x10a   :  { %5714 = vmatpush1.xpose.msk.msra.mxu1 %vm3155_vm8, %v6112_v31  ;;  %5715 = vmatprep.subr.msk.mxu0 %vm3158_vm9, %v6112_v31  ;;  %vm3171_vm8 = vcmp.eq.s32.totalorder %v6255_v41, %v2984_v42  ;;  %vm3174_vm9 = vcmp.eq.s32.totalorder %v6255_v41, %v2996_v43  ;;  %v3012_v59 = vrot.slane %v2756_v53, %v6271_v7  ;;  %v2625_v42 = vunpack.c.2.s8 %v6439_v22  ;;  %v6477_v53 = vld [vmem:[#allocation3 + $0x30] sm:$0xff] }
 0x10b   :  { %5717 = vmatprep.subr.msk.mxu1 %vm3160_vm10, %v6112_v31  ;;  %vm3176_vm10 = vcmp.eq.s32.totalorder %v6255_v41, %v3004_v45  ;;  %v2992_v57 = vrot.slane %v2736_v50, %v6271_v7  ;;  %v2812_v37 = vrot.slane %v2624_v29, %v6262_v56  ;;  %v2808_v50 = vrot.slane %v2624_v29, %v6271_v7 }
 0x10d   :  { %v531_v2 = vpop.f32.mrb[2].mxu0  ;;  %v3068_v43 = vrot.slane %v2812_v37, %v6271_v7  ;;  %v3064_v55 = vrot.slane %v2808_v50, %v6271_v7 }
 0x10e   :  { %v602_v3 = vpop.f32.mrb[2].mxu1  ;;  %v533_v4 = vpop.f32.mrb[3].mxu0 }
 0x10f   :  { %v604_v6 = vpop.f32.mrb[3].mxu1  ;;  %3545 = vmatprep.mubr.f32.mxu0 %v533_v4 }
 0x110   :  { %3615 = vmatprep.mubr.f32.mxu1 %v604_v6  ;;  %3546 = vmatmul.mubr.f32.vlgmr.msra.gmra.mrb[34].mxu0 %v531_v2  ;;  %v2772_v6 = vrot.slane %v2619_v60, %v6262_v56 }
 0x111   :  { %3616 = vmatmul.mubr.f32.vlgmr.msra.gmra.mrb[34].mxu1 %v602_v3  ;;  %5716 = vmatpush1.xpose.msk.msra.mxu0 %vm3157_vm11, %v6112_v31  ;;  %vm3173_vm11 = vcmp.eq.s32.totalorder %v6255_v41, %v2992_v57  ;;  %v2752_v3 = vrot.slane %v2617_v44, %v6271_v7  ;;  %v2626_v44 = vunpack.c.3.s8 %v6439_v22 }
 0x112   :  { %5718 = vmatpush1.xpose.msk.msra.mxu1 %vm3159_vm12, %v6112_v31  ;;  %5719 = vmatprep.subr.msk.mxu0 %vm3162_vm13, %v6112_v31  ;;  %vm3175_vm12 = vcmp.eq.s32.totalorder %v6255_v41, %v3000_v58  ;;  %vm3178_vm13 = vcmp.eq.s32.totalorder %v6255_v41, %v3012_v59  ;;  %v3028_v10 = vrot.slane %v2772_v6, %v6271_v7  ;;  %v2627_v58 = vunpack.c.0.s8 %v6477_v53 }
 0x113   :  { %5721 = vmatprep.subr.msk.mxu1 %vm3164_vm14, %v6112_v31  ;;  %vm3180_vm14 = vcmp.eq.s32.totalorder %v6255_v41, %v3020_v61  ;;  %v3008_v8 = vrot.slane %v2752_v3, %v6271_v7  ;;  %v2828_v52 = vrot.slane %v2626_v44, %v6262_v56  ;;  %v2824_v3 = vrot.slane %v2626_v44, %v6271_v7 }
 0x115   :  { %v673_v16 = vpop.f32.mrb[4].mxu0  ;;  %v3084_v59 = vrot.slane %v2828_v52, %v6271_v7  ;;  %v3080_v26 = vrot.slane %v2824_v3, %v6271_v7 }
 0x116   :  { %v744_v17 = vpop.f32.mrb[4].mxu1  ;;  %v675_v18 = vpop.f32.mrb[5].mxu0 }
 0x117   :  { %v746_v20 = vpop.f32.mrb[5].mxu1  ;;  %3685 = vmatprep.mubr.f32.mxu0 %v675_v18 }
 0x118   :  { %3755 = vmatprep.mubr.f32.mxu1 %v746_v20  ;;  %3686 = vmatmul.mubr.f32.vlgmr.msra.gmra.mrb[36].mxu0 %v673_v16  ;;  %v2788_v20 = vrot.slane %v2621_v11, %v6262_v56 }
 0x119   :  { %3756 = vmatmul.mubr.f32.vlgmr.msra.gmra.mrb[36].mxu1 %v744_v17  ;;  %5720 = vmatpush1.xpose.msk.msra.mxu0 %vm3161_vm15, %v6112_v31  ;;  %vm3177_vm15 = vcmp.eq.s32.totalorder %v6255_v41, %v3008_v8  ;;  %v2768_v17 = vrot.slane %v2619_v60, %v6271_v7  ;;  %v2628_v60 = vunpack.c.1.s8 %v6477_v53 }
 0x11a   :  { %5722 = vmatpush1.xpose.msk.msra.mxu1 %vm3163_vm0, %v6112_v31  ;;  %5723 = vmatprep.subr.msk.mxu0 %vm3166_vm1, %v6112_v31  ;;  %vm3179_vm0 = vcmp.eq.s32.totalorder %v6255_v41, %v3016_v9  ;;  %vm3182_vm1 = vcmp.eq.s32.totalorder %v6255_v41, %v3028_v10  ;;  %v3044_v25 = vrot.slane %v2788_v20, %v6271_v7  ;;  %v2629_v9 = vunpack.c.2.s8 %v6477_v53  ;;  %v6515_v20 = vld [vmem:[#allocation3 + $0x38] sm:$0xff] }
 0x11b   :  { %5725 = vmatprep.subr.msk.mxu1 %vm3168_vm2, %v6112_v31  ;;  %vm3184_vm2 = vcmp.eq.s32.totalorder %v6255_v41, %v3036_v12  ;;  %v3024_v23 = vrot.slane %v2768_v17, %v6271_v7  ;;  %v2844_v5 = vrot.slane %v2628_v60, %v6262_v56  ;;  %v2840_v17 = vrot.slane %v2628_v60, %v6271_v7 }
 0x11d   :  { %v815_v0 = vpop.f32.mrb[6].mxu0  ;;  %v3100_v10 = vrot.slane %v2844_v5, %v6271_v7  ;;  %v3096_v22 = vrot.slane %v2840_v17, %v6271_v7 }
 0x11e   :  { %v886_v33 = vpop.f32.mrb[6].mxu1  ;;  %v817_v34 = vpop.f32.mrb[7].mxu0 }
 0x11f   :  { %v888_v36 = vpop.f32.mrb[7].mxu1  ;;  %3825 = vmatprep.mubr.f32.mxu0 %v817_v34 }
 0x120   :  { %3895 = vmatprep.mubr.f32.mxu1 %v888_v36  ;;  %3826 = vmatmul.mubr.f32.vlgmr.msra.gmra.mrb[38].mxu0 %v815_v0  ;;  %v2804_v36 = vrot.slane %v2623_v27, %v6262_v56 }
 0x121   :  { %3896 = vmatmul.mubr.f32.vlgmr.msra.gmra.mrb[38].mxu1 %v886_v33  ;;  %5724 = vmatpush1.xpose.msk.msra.mxu0 %vm3165_vm3, %v6112_v31  ;;  %vm3181_vm3 = vcmp.eq.s32.totalorder %v6255_v41, %v3024_v23  ;;  %v2784_v33 = vrot.slane %v2621_v11, %v6271_v7  ;;  %v2630_v11 = vunpack.c.3.s8 %v6477_v53 }
 0x122   :  { %5726 = vmatpush1.xpose.msk.msra.mxu1 %vm3167_vm4, %v6112_v31  ;;  %5727 = vmatprep.subr.msk.mxu0 %vm3170_vm5, %v6112_v31  ;;  %vm3183_vm4 = vcmp.eq.s32.totalorder %v6255_v41, %v3032_v24  ;;  %vm3186_vm5 = vcmp.eq.s32.totalorder %v6255_v41, %v3044_v25  ;;  %v3060_v40 = vrot.slane %v2804_v36, %v6271_v7  ;;  %v2631_v24 = vunpack.c.0.s8 %v6515_v20 }
 0x123   :  { %5729 = vmatprep.subr.msk.mxu1 %vm3172_vm6, %v6112_v31  ;;  %vm3188_vm6 = vcmp.eq.s32.totalorder %v6255_v41, %v3052_v28  ;;  %v3040_v38 = vrot.slane %v2784_v33, %v6271_v7  ;;  %v2860_v19 = vrot.slane %v2630_v11, %v6262_v56  ;;  %v2856_v33 = vrot.slane %v2630_v11, %v6271_v7 }
 0x125   :  { %v957_v47 = vpop.f32.mrb[8].mxu0  ;;  %v3116_v25 = vrot.slane %v2860_v19, %v6271_v7  ;;  %v3112_v37 = vrot.slane %v2856_v33, %v6271_v7 }
 0x126   :  { %v1028_v48 = vpop.f32.mrb[8].mxu1  ;;  %v959_v49 = vpop.f32.mrb[9].mxu0 }
 0x127   :  { %v1030_v51 = vpop.f32.mrb[9].mxu1  ;;  %3965 = vmatprep.mubr.f32.mxu0 %v959_v49 }
 0x128   :  { %4035 = vmatprep.mubr.f32.mxu1 %v1030_v51  ;;  %3966 = vmatmul.mubr.f32.vlgmr.msra.gmra.mrb[40].mxu0 %v957_v47  ;;  %v2820_v51 = vrot.slane %v2625_v42, %v6262_v56 }
 0x129   :  { %4036 = vmatmul.mubr.f32.vlgmr.msra.gmra.mrb[40].mxu1 %v1028_v48  ;;  %5728 = vmatpush1.xpose.msk.msra.mxu0 %vm3169_vm7, %v6112_v31  ;;  %vm3185_vm7 = vcmp.eq.s32.totalorder %v6255_v41, %v3040_v38  ;;  %v2800_v48 = vrot.slane %v2623_v27, %v6271_v7  ;;  %v2632_v27 = vunpack.c.1.s8 %v6515_v20 }
 0x12a   :  { %5730 = vmatpush1.xpose.msk.msra.mxu1 %vm3171_vm8, %v6112_v31  ;;  %5731 = vmatprep.subr.msk.mxu0 %vm3174_vm9, %v6112_v31  ;;  %vm3187_vm8 = vcmp.eq.s32.totalorder %v6255_v41, %v3048_v39  ;;  %vm3190_vm9 = vcmp.eq.s32.totalorder %v6255_v41, %v3060_v40  ;;  %v3076_v57 = vrot.slane %v2820_v51, %v6271_v7  ;;  %v2633_v39 = vunpack.c.2.s8 %v6515_v20 }
 0x12b   :  { %5733 = vmatprep.subr.msk.mxu1 %vm3176_vm10, %v6112_v31  ;;  %vm3192_vm10 = vcmp.eq.s32.totalorder %v6255_v41, %v3068_v43  ;;  %v3056_v54 = vrot.slane %v2800_v48, %v6271_v7  ;;  %v2876_v35 = vrot.slane %v2632_v27, %v6262_v56  ;;  %v2872_v48 = vrot.slane %v2632_v27, %v6271_v7 }
 0x12d   :  { %v1099_v63 = vpop.f32.mrb[10].mxu0  ;;  %v3132_v40 = vrot.slane %v2876_v35, %v6271_v7  ;;  %v3128_v52 = vrot.slane %v2872_v48, %v6271_v7 }
 0x12e   :  { %v1170_v1 = vpop.f32.mrb[10].mxu1  ;;  %v1101_v2 = vpop.f32.mrb[11].mxu0 }
 0x12f   :  { %v1172_v4 = vpop.f32.mrb[11].mxu1  ;;  %4105 = vmatprep.mubr.f32.mxu0 %v1101_v2 }
 0x130   :  { %4175 = vmatprep.mubr.f32.mxu1 %v1172_v4  ;;  %4106 = vmatmul.mubr.f32.vlgmr.msra.gmra.mrb[42].mxu0 %v1099_v63  ;;  %v2836_v4 = vrot.slane %v2627_v58, %v6262_v56 }
 0x131   :  { %4176 = vmatmul.mubr.f32.vlgmr.msra.gmra.mrb[42].mxu1 %v1170_v1  ;;  %5732 = vmatpush1.xpose.msk.msra.mxu0 %vm3173_vm11, %v6112_v31  ;;  %vm3189_vm11 = vcmp.eq.s32.totalorder %v6255_v41, %v3056_v54  ;;  %v2816_v1 = vrot.slane %v2625_v42, %v6271_v7  ;;  %v2634_v42 = vunpack.c.3.s8 %v6515_v20 }
 0x132   :  { %5734 = vmatpush1.xpose.msk.msra.mxu1 %vm3175_vm12, %v6112_v31  ;;  %5735 = vmatprep.subr.msk.mxu0 %vm3178_vm13, %v6112_v31  ;;  %vm3191_vm12 = vcmp.eq.s32.totalorder %v6255_v41, %v3064_v55  ;;  %vm3194_vm13 = vcmp.eq.s32.totalorder %v6255_v41, %v3076_v57  ;;  %v3092_v8 = vrot.slane %v2836_v4, %v6271_v7 }
 0x133   :  { %5737 = vmatprep.subr.msk.mxu1 %vm3180_vm14, %v6112_v31  ;;  %vm3196_vm14 = vcmp.eq.s32.totalorder %v6255_v41, %v3084_v59  ;;  %v3072_v6 = vrot.slane %v2816_v1, %v6271_v7  ;;  %v2892_v50 = vrot.slane %v2634_v42, %v6262_v56  ;;  %v2888_v60 = vrot.slane %v2634_v42, %v6271_v7 }
 0x135   :  { %v1241_v14 = vpop.f32.mrb[12].mxu0  ;;  %v3148_v54 = vrot.slane %v2892_v50, %v6271_v7 }
 0x136   :  { %v1312_v15 = vpop.f32.mrb[12].mxu1  ;;  %v1243_v16 = vpop.f32.mrb[13].mxu0 }
 0x137   :  { %v1314_v18 = vpop.f32.mrb[13].mxu1  ;;  %4245 = vmatprep.mubr.f32.mxu0 %v1243_v16 }
 0x138   :  { %4315 = vmatprep.mubr.f32.mxu1 %v1314_v18  ;;  %4246 = vmatmul.mubr.f32.vlgmr.msra.gmra.mrb[44].mxu0 %v1241_v14  ;;  %v2852_v18 = vrot.slane %v2629_v9, %v6262_v56 }
 0x139   :  { %4316 = vmatmul.mubr.f32.vlgmr.msra.gmra.mrb[44].mxu1 %v1312_v15  ;;  %5736 = vmatpush1.xpose.msk.msra.mxu0 %vm3177_vm15, %v6112_v31  ;;  %vm3193_vm15 = vcmp.eq.s32.totalorder %v6255_v41, %v3072_v6  ;;  %v2832_v15 = vrot.slane %v2627_v58, %v6271_v7  ;;  %v2880_v58 = vrot.slane %v2633_v39, %v6271_v7 }
 0x13a   :  { %5738 = vmatpush1.xpose.msk.msra.mxu1 %vm3179_vm0, %v6112_v31  ;;  %5739 = vmatprep.subr.msk.mxu0 %vm3182_vm1, %v6112_v31  ;;  %vm3195_vm0 = vcmp.eq.s32.totalorder %v6255_v41, %v3080_v26  ;;  %vm3198_vm1 = vcmp.eq.s32.totalorder %v6255_v41, %v3092_v8  ;;  %v3108_v23 = vrot.slane %v2852_v18, %v6271_v7 }
 0x13b   :  { %5741 = vmatprep.subr.msk.mxu1 %vm3184_vm2, %v6112_v31  ;;  %vm3200_vm2 = vcmp.eq.s32.totalorder %v6255_v41, %v3100_v10  ;;  %v3088_v21 = vrot.slane %v2832_v15, %v6271_v7 }
 0x13d   :  { %v1383_v30 = vpop.f32.mrb[14].mxu0 }
 0x13e   :  { %v1454_v32 = vpop.f32.mrb[14].mxu1  ;;  %v1385_v0 = vpop.f32.mrb[15].mxu0 }
 0x13f   :  { %v1456_v34 = vpop.f32.mrb[15].mxu1  ;;  %4385 = vmatprep.mubr.f32.mxu0 %v1385_v0 }
 0x140   :  { %4455 = vmatprep.mubr.f32.mxu1 %v1456_v34  ;;  %4386 = vmatmul.mubr.f32.vlgmr.msra.gmra.mrb[46].mxu0 %v1383_v30  ;;  %v2868_v34 = vrot.slane %v2631_v24, %v6262_v56 }
 0x141   :  { %4456 = vmatmul.mubr.f32.vlgmr.msra.gmra.mrb[46].mxu1 %v1454_v32  ;;  %5740 = vmatpush1.xpose.msk.msra.mxu0 %vm3181_vm3, %v6112_v31  ;;  %vm3197_vm3 = vcmp.eq.s32.totalorder %v6255_v41, %v3088_v21  ;;  %v2848_v32 = vrot.slane %v2629_v9, %v6271_v7 }
 0x142   :  { %5742 = vmatpush1.xpose.msk.msra.mxu1 %vm3183_vm4, %v6112_v31  ;;  %5743 = vmatprep.subr.msk.mxu0 %vm3186_vm5, %v6112_v31  ;;  %vm3199_vm4 = vcmp.eq.s32.totalorder %v6255_v41, %v3096_v22  ;;  %vm3202_vm5 = vcmp.eq.s32.totalorder %v6255_v41, %v3108_v23  ;;  %v3124_v38 = vrot.slane %v2868_v34, %v6271_v7 }
 0x143   :  { %5745 = vmatprep.subr.msk.mxu1 %vm3188_vm6, %v6112_v31  ;;  %vm3204_vm6 = vcmp.eq.s32.totalorder %v6255_v41, %v3116_v25  ;;  %v3104_v36 = vrot.slane %v2848_v32, %v6271_v7 }
 0x145   :  { %v1525_v45 = vpop.f32.mrb[16].mxu0 }
 0x146   :  { %v1596_v46 = vpop.f32.mrb[16].mxu1  ;;  %v1527_v47 = vpop.f32.mrb[17].mxu0 }
 0x147   :  { %v1598_v49 = vpop.f32.mrb[17].mxu1  ;;  %4525 = vmatprep.mubr.f32.mxu0 %v1527_v47 }
 0x148   :  { %4595 = vmatprep.mubr.f32.mxu1 %v1598_v49  ;;  %4526 = vmatmul.mubr.f32.vlgmr.msra.gmra.mrb[48].mxu0 %v1525_v45  ;;  %v2884_v49 = vrot.slane %v2633_v39, %v6262_v56 }
 0x149   :  { %4596 = vmatmul.mubr.f32.vlgmr.msra.gmra.mrb[48].mxu1 %v1596_v46  ;;  %5744 = vmatpush1.xpose.msk.msra.mxu0 %vm3185_vm7, %v6112_v31  ;;  %vm3201_vm7 = vcmp.eq.s32.totalorder %v6255_v41, %v3104_v36  ;;  %v2864_v46 = vrot.slane %v2631_v24, %v6271_v7 }
 0x14a   :  { %5746 = vmatpush1.xpose.msk.msra.mxu1 %vm3187_vm8, %v6112_v31  ;;  %5747 = vmatprep.subr.msk.mxu0 %vm3190_vm9, %v6112_v31  ;;  %vm3203_vm8 = vcmp.eq.s32.totalorder %v6255_v41, %v3112_v37  ;;  %vm3206_vm9 = vcmp.eq.s32.totalorder %v6255_v41, %v3124_v38  ;;  %v3140_v53 = vrot.slane %v2884_v49, %v6271_v7 }
 0x14b   :  { %5749 = vmatprep.subr.msk.mxu1 %vm3192_vm10, %v6112_v31  ;;  %vm3208_vm10 = vcmp.eq.s32.totalorder %v6255_v41, %v3132_v40  ;;  %v3120_v51 = vrot.slane %v2864_v46, %v6271_v7 }
 0x14d   :  { %v1667_v61 = vpop.f32.mrb[18].mxu0 }
 0x14e   :  { %v1738_v62 = vpop.f32.mrb[18].mxu1  ;;  %v1669_v63 = vpop.f32.mrb[19].mxu0 }
 0x14f   :  { %v1740_v2 = vpop.f32.mrb[19].mxu1  ;;  %4665 = vmatprep.mubr.f32.mxu0 %v1669_v63 }
 0x150   :  { %4735 = vmatprep.mubr.f32.mxu1 %v1740_v2  ;;  %4666 = vmatmul.mubr.f32.vlgmr.msra.gmra.mrb[50].mxu0 %v1667_v61  ;;  %v3136_v61 = vrot.slane %v2880_v58, %v6271_v7 }
 0x151   :  { %4736 = vmatmul.mubr.f32.vlgmr.msra.gmra.mrb[50].mxu1 %v1738_v62  ;;  %5748 = vmatpush1.xpose.msk.msra.mxu0 %vm3189_vm11, %v6112_v31  ;;  %vm3205_vm11 = vcmp.eq.s32.totalorder %v6255_v41, %v3120_v51  ;;  %v3144_v62 = vrot.slane %v2888_v60, %v6271_v7 }
 0x152   :  { %5750 = vmatpush1.xpose.msk.msra.mxu1 %vm3191_vm12, %v6112_v31  ;;  %5751 = vmatprep.subr.msk.mxu0 %vm3194_vm13, %v6112_v31  ;;  %vm3207_vm12 = vcmp.eq.s32.totalorder %v6255_v41, %v3128_v52  ;;  %vm3210_vm13 = vcmp.eq.s32.totalorder %v6255_v41, %v3140_v53 }
 0x153   :  { %5753 = vmatprep.subr.msk.mxu1 %vm3196_vm14, %v6112_v31  ;;  %vm3212_vm14 = vcmp.eq.s32.totalorder %v6255_v41, %v3148_v54 }
 0x155   :  { %v1809_v12 = vpop.f32.mrb[20].mxu0 }
 0x156   :  { %v1880_v13 = vpop.f32.mrb[20].mxu1  ;;  %v1811_v14 = vpop.f32.mrb[21].mxu0 }
 0x157   :  { %v1882_v16 = vpop.f32.mrb[21].mxu1  ;;  %4805 = vmatprep.mubr.f32.mxu0 %v1811_v14 }
 0x158   :  { %4875 = vmatprep.mubr.f32.mxu1 %v1882_v16  ;;  %4806 = vmatmul.mubr.f32.vlgmr.msra.gmra.mrb[52].mxu0 %v1809_v12 }
 0x159   :  { %4876 = vmatmul.mubr.f32.vlgmr.msra.gmra.mrb[52].mxu1 %v1880_v13  ;;  %5752 = vmatpush1.xpose.msk.msra.mxu0 %vm3193_vm15, %v6112_v31  ;;  %vm3209_vm15 = vcmp.eq.s32.totalorder %v6255_v41, %v3136_v61 }
 0x15a   :  { %5754 = vmatpush1.xpose.msk.msra.mxu1 %vm3195_vm0, %v6112_v31  ;;  %5755 = vmatprep.subr.msk.mxu0 %vm3198_vm1, %v6112_v31  ;;  %vm3211_vm0 = vcmp.eq.s32.totalorder %v6255_v41, %v3144_v62  ;;  %vm5583_vm1 = vcmask 57344  }
 0x15b   :  { %5757 = vmatprep.subr.msk.mxu1 %vm3200_vm2, %v6112_v31 }
 0x15d   :  { %v1951_v28 = vpop.f32.mrb[22].mxu0 }
 0x15e   :  { %v2022_v29 = vpop.f32.mrb[22].mxu1  ;;  %v1953_v30 = vpop.f32.mrb[23].mxu0 }
 0x15f   :  { %v2024_v0 = vpop.f32.mrb[23].mxu1  ;;  %4945 = vmatprep.mubr.f32.mxu0 %v1953_v30 }
 0x160   :  { %5015 = vmatprep.mubr.f32.mxu1 %v2024_v0  ;;  %4946 = vmatmul.mubr.f32.vlgmr.msra.gmra.mrb[54].mxu0 %v1951_v28 }
 0x161   :  { %5016 = vmatmul.mubr.f32.vlgmr.msra.gmra.mrb[54].mxu1 %v2022_v29  ;;  %5756 = vmatpush1.xpose.msk.msra.mxu0 %vm3197_vm3, %v6112_v31 }
 0x162   :  { %5758 = vmatpush1.xpose.msk.msra.mxu1 %vm3199_vm4, %v6112_v31  ;;  %5759 = vmatprep.subr.msk.mxu0 %vm3202_vm5, %v6112_v31 }
 0x163   :  { %5761 = vmatprep.subr.msk.mxu1 %vm3204_vm6, %v6112_v31 }
 0x165   :  { %v2093_v43 = vpop.f32.mrb[24].mxu0 }
 0x166   :  { %v2164_v44 = vpop.f32.mrb[24].mxu1  ;;  %v2095_v45 = vpop.f32.mrb[25].mxu0 }
 0x167   :  { %v2166_v47 = vpop.f32.mrb[25].mxu1  ;;  %5085 = vmatprep.mubr.f32.mxu0 %v2095_v45 }
 0x168   :  { %5155 = vmatprep.mubr.f32.mxu1 %v2166_v47  ;;  %5086 = vmatmul.mubr.f32.vlgmr.msra.gmra.mrb[56].mxu0 %v2093_v43 }
 0x169   :  { %5156 = vmatmul.mubr.f32.vlgmr.msra.gmra.mrb[56].mxu1 %v2164_v44  ;;  %5760 = vmatpush1.xpose.msk.msra.mxu0 %vm3201_vm7, %v6112_v31 }
 0x16a   :  { %5762 = vmatpush1.xpose.msk.msra.mxu1 %vm3203_vm8, %v6112_v31  ;;  %5763 = vmatprep.subr.msk.mxu0 %vm3206_vm9, %v6112_v31 }
 0x16b   :  { %5765 = vmatprep.subr.msk.mxu1 %vm3208_vm10, %v6112_v31 }
 0x16d   :  { %v2235_v55 = vpop.f32.mrb[26].mxu0 }
 0x16e   :  { %v2306_v57 = vpop.f32.mrb[26].mxu1  ;;  %v2237_v56 = vpop.f32.mrb[27].mxu0 }
 0x16f   :  { %v2308_v59 = vpop.f32.mrb[27].mxu1  ;;  %5225 = vmatprep.mubr.f32.mxu0 %v2237_v56 }
 0x170   :  { %5295 = vmatprep.mubr.f32.mxu1 %v2308_v59  ;;  %5226 = vmatmul.mubr.f32.vlgmr.msra.gmra.mrb[58].mxu0 %v2235_v55 }
 0x171   :  { %5296 = vmatmul.mubr.f32.vlgmr.msra.gmra.mrb[58].mxu1 %v2306_v57  ;;  %5764 = vmatpush1.xpose.msk.msra.mxu0 %vm3205_vm11, %v6112_v31 }
 0x172   :  { %5766 = vmatpush1.xpose.msk.msra.mxu1 %vm3207_vm12, %v6112_v31  ;;  %5767 = vmatprep.subr.msk.mxu0 %vm3210_vm13, %v6112_v31 }
 0x173   :  { %5769 = vmatprep.subr.msk.mxu1 %vm3212_vm14, %v6112_v31 }
 0x175   :  { %v2377_v63 = vpop.f32.mrb[28].mxu0 }
 0x176   :  { %v2448_v1 = vpop.f32.mrb[28].mxu1  ;;  %v2379_v2 = vpop.f32.mrb[29].mxu0 }
 0x177   :  { %v2450_v3 = vpop.f32.mrb[29].mxu1  ;;  %5365 = vmatprep.mubr.f32.mxu0 %v2379_v2 }
 0x178   :  { %5435 = vmatprep.mubr.f32.mxu1 %v2450_v3  ;;  %5366 = vmatmul.mubr.f32.vlgmr.msra.gmra.mrb[60].mxu0 %v2377_v63 }
 0x179   :  { %5436 = vmatmul.mubr.f32.vlgmr.msra.gmra.mrb[60].mxu1 %v2448_v1  ;;  %5768 = vmatpush1.xpose.msk.msra.mxu0 %vm3209_vm15, %v6112_v31 }
 0x17a   :  { %5770 = vmatpush1.xpose.msk.msra.mxu1 %vm3211_vm0, %v6112_v31 }
 0x17d   :  { %v2519_v4 = vpop.f32.mrb[30].mxu0 }
 0x17e   :  { %v2590_v5 = vpop.f32.mrb[30].mxu1  ;;  %v2521_v6 = vpop.f32.mrb[31].mxu0 }
 0x17f   :  { %v2592_v7 = vpop.f32.mrb[31].mxu1  ;;  %5505 = vmatprep.mubr.f32.mxu0 %v2521_v6 }
 0x180   :  { %5575 = vmatprep.mubr.f32.mxu1 %v2592_v7  ;;  %5506 = vmatmul.mubr.f32.vlgmr.msra.gmra.mrb[62].mxu0 %v2519_v4 }
 0x181   :  { %5576 = vmatmul.mubr.f32.vlgmr.msra.gmra.mrb[62].mxu1 %v2590_v5 }
 0x1db   :  { %v3407_v26 = vpop.f32.mrb[32].mxu0 }
 0x1dc   :  { %v3477_v8 = vpop.f32.mrb[32].mxu1  ;;  %v3409_v9 = vpop.f32.mrb[33].mxu0 }
 0x1dd   :  { %v3478_v10 = vadd.f32 %v3477_v8, %v3407_v26  ;;  %v3479_v41 = vpop.f32.mrb[33].mxu1 }
 0x1e3   :  { %v3547_v11 = vpop.f32.mrb[34].mxu0 }
 0x1e4   :  { %v3548_v12 = vadd.f32 %v3547_v11, %v3478_v10  ;;  %v3617_v13 = vpop.f32.mrb[34].mxu1  ;;  %v3549_v14 = vpop.f32.mrb[35].mxu0 }
 0x1e5   :  { %v3619_v15 = vpop.f32.mrb[35].mxu1 }
 0x1e6   :  { %v3618_v16 = vadd.f32 %v3617_v13, %v3548_v12 }
 0x1eb   :  { %v3687_v31 = vpop.f32.mrb[36].mxu0 }
 0x1ec   :  { %v3688_v17 = vadd.f32 %v3687_v31, %v3618_v16  ;;  %v3757_v18 = vpop.f32.mrb[36].mxu1  ;;  %v3689_v19 = vpop.f32.mrb[37].mxu0 }
 0x1ed   :  { %v3759_v20 = vpop.f32.mrb[37].mxu1 }
 0x1ee   :  { %v3758_v21 = vadd.f32 %v3757_v18, %v3688_v17 }
 0x1f3   :  { %v3827_v22 = vpop.f32.mrb[38].mxu0 }
 0x1f4   :  { %v3828_v23 = vadd.f32 %v3827_v22, %v3758_v21  ;;  %v3897_v24 = vpop.f32.mrb[38].mxu1  ;;  %v3829_v25 = vpop.f32.mrb[39].mxu0 }
 0x1f5   :  { %v3899_v27 = vpop.f32.mrb[39].mxu1 }
 0x1f6   :  { %v3898_v28 = vadd.f32 %v3897_v24, %v3828_v23 }
 0x1fb   :  { %v3967_v29 = vpop.f32.mrb[40].mxu0 }
 0x1fc   :  { %v3968_v30 = vadd.f32 %v3967_v29, %v3898_v28  ;;  %v4037_v32 = vpop.f32.mrb[40].mxu1  ;;  %v3969_v0 = vpop.f32.mrb[41].mxu0 }
 0x1fd   :  { %v4039_v33 = vpop.f32.mrb[41].mxu1 }
 0x1fe   :  { %v4038_v34 = vadd.f32 %v4037_v32, %v3968_v30 }
 0x203   :  { %v4107_v35 = vpop.f32.mrb[42].mxu0 }
 0x204   :  { %v4108_v36 = vadd.f32 %v4107_v35, %v4038_v34  ;;  %v4177_v37 = vpop.f32.mrb[42].mxu1  ;;  %v4109_v38 = vpop.f32.mrb[43].mxu0  ;;  %v5581_v35 = vld [vmem:[#allocation8] sm:$0x1] }
 0x205   :  { %v4179_v39 = vpop.f32.mrb[43].mxu1 }
 0x206   :  { %v4178_v40 = vadd.f32 %v4177_v37, %v4108_v36  ;;  %v5592_v39 = vstv %s6595_s3 }
 0x20b   :  { %v4247_v42 = vpop.f32.mrb[44].mxu0 }
 0x20c   :  { %v4248_v43 = vadd.f32 %v4247_v42, %v4178_v40  ;;  %v4317_v44 = vpop.f32.mrb[44].mxu1  ;;  %v4249_v45 = vpop.f32.mrb[45].mxu0 }
 0x20d   :  { %v4319_v46 = vpop.f32.mrb[45].mxu1 }
 0x20e   :  { %v4318_v47 = vadd.f32 %v4317_v44, %v4248_v43 }
 0x213   :  { %v4387_v48 = vpop.f32.mrb[46].mxu0 }
 0x214   :  { %v4388_v49 = vadd.f32 %v4387_v48, %v4318_v47  ;;  %v4457_v50 = vpop.f32.mrb[46].mxu1  ;;  %v4389_v51 = vpop.f32.mrb[47].mxu0 }
 0x215   :  { %v4459_v52 = vpop.f32.mrb[47].mxu1 }
 0x216   :  { %v4458_v53 = vadd.f32 %v4457_v50, %v4388_v49 }
 0x21b   :  { %v4527_v54 = vpop.f32.mrb[48].mxu0 }
 0x21c   :  { %v4528_v55 = vadd.f32 %v4527_v54, %v4458_v53  ;;  %v4597_v57 = vpop.f32.mrb[48].mxu1  ;;  %v4529_v56 = vpop.f32.mrb[49].mxu0 }
 0x21d   :  { %v4599_v58 = vpop.f32.mrb[49].mxu1 }
 0x21e   :  { %v4598_v59 = vadd.f32 %v4597_v57, %v4528_v55 }
 0x223   :  { %v4667_v60 = vpop.f32.mrb[50].mxu0 }
 0x224   :  { %v4668_v61 = vadd.f32 %v4667_v60, %v4598_v59  ;;  %v4737_v62 = vpop.f32.mrb[50].mxu1  ;;  %v4669_v63 = vpop.f32.mrb[51].mxu0 }
 0x225   :  { %v4739_v1 = vpop.f32.mrb[51].mxu1 }
 0x226   :  { %v4738_v2 = vadd.f32 %v4737_v62, %v4668_v61 }
 0x22b   :  { %v4807_v3 = vpop.f32.mrb[52].mxu0 }
 0x22c   :  { %v4808_v4 = vadd.f32 %v4807_v3, %v4738_v2  ;;  %v4877_v5 = vpop.f32.mrb[52].mxu1  ;;  %v4809_v6 = vpop.f32.mrb[53].mxu0 }
 0x22d   :  { %v4879_v7 = vpop.f32.mrb[53].mxu1 }
 0x22e   :  { %v4878_v26 = vadd.f32 %v4877_v5, %v4808_v4 }
 0x233   :  { %v4947_v8 = vpop.f32.mrb[54].mxu0 }
 0x234   :  { %v4948_v9 = vadd.f32 %v4947_v8, %v4878_v26  ;;  %v5017_v10 = vpop.f32.mrb[54].mxu1  ;;  %v4949_v41 = vpop.f32.mrb[55].mxu0 }
 0x235   :  { %v5019_v11 = vpop.f32.mrb[55].mxu1 }
 0x236   :  { %v5018_v12 = vadd.f32 %v5017_v10, %v4948_v9 }
 0x23b   :  { %v5087_v13 = vpop.f32.mrb[56].mxu0 }
 0x23c   :  { %v5088_v14 = vadd.f32 %v5087_v13, %v5018_v12  ;;  %v5157_v15 = vpop.f32.mrb[56].mxu1  ;;  %v5089_v16 = vpop.f32.mrb[57].mxu0 }
 0x23d   :  { %v5159_v31 = vpop.f32.mrb[57].mxu1 }
 0x23e   :  { %v5158_v17 = vadd.f32 %v5157_v15, %v5088_v14 }
 0x243   :  { %v5227_v18 = vpop.f32.mrb[58].mxu0 }
 0x244   :  { %v5228_v19 = vadd.f32 %v5227_v18, %v5158_v17  ;;  %v5297_v20 = vpop.f32.mrb[58].mxu1  ;;  %v5229_v21 = vpop.f32.mrb[59].mxu0 }
 0x245   :  { %v5299_v22 = vpop.f32.mrb[59].mxu1 }
 0x246   :  { %v5298_v23 = vadd.f32 %v5297_v20, %v5228_v19 }
 0x24b   :  { %v5367_v24 = vpop.f32.mrb[60].mxu0 }
 0x24c   :  { %v5368_v25 = vadd.f32 %v5367_v24, %v5298_v23  ;;  %v5437_v27 = vpop.f32.mrb[60].mxu1  ;;  %v5369_v28 = vpop.f32.mrb[61].mxu0 }
 0x24d   :  { %v5439_v29 = vpop.f32.mrb[61].mxu1 }
 0x24e   :  { %v5438_v30 = vadd.f32 %v5437_v27, %v5368_v25 }
 0x253   :  { %v5507_v32 = vpop.f32.mrb[62].mxu0 }
 0x254   :  { %v5508_v0 = vadd.f32 %v5507_v32, %v5438_v30  ;;  %v5577_v33 = vpop.f32.mrb[62].mxu1  ;;  %v5509_v34 = vpop.f32.mrb[63].mxu0 }
 0x255   :  { %v5579_v36 = vpop.f32.mrb[63].mxu1 }
 0x256   :  { %v5578_v37 = vadd.f32 %v5577_v33, %v5508_v0 }
 0x258   :  { %v5582_v38 = vadd.f32 %v5581_v35, %v5578_v37 }
 0x25a   :  { %5584 = vst.msk [vmem:[#allocation8] sm:$0x1] %vm5583_vm1, %v5582_v38 }
 0x261   :  { %v5590_v40 = vld [vmem:[#allocation8] sm:$0x1] }
 0x262   :  { %v5593_v42 = vadd.f32 %v5592_v39, %v5590_v40 }
 0x264   :  { %5594 = vst [vmem:[#allocation8] sm:$0x1] %v5593_v42 }
 0x265   :  { %6090 = shalt.err (!%p6087_p6)
}
 0x266   :  { %s6091_s24 = scalar_lea.hbm %s6596_s4, 16 }
 0x267   :  { %p6092_p7 = scmp.ne.s32.totalorder %s6596_s4, %s6091_s24  ;;  %p6095_p8 = scmp.lt.u32.totalorder %s6091_s24, %s6596_s4 }
 0x269   :  { %p6097_p9 = pnand %p6095_p8, %p6092_p7 }
 0x26b   :  { %6100 = shalt.err (!%p6097_p9)
}
 0x26c   :  { %5604 = dma.vmem_to_hbm [thread:$0]  %s5602_s19, 16, %s6596_s4, [#allocation5]  }
 0x26d   :  { %6105 = dma.done.wait [#allocation5], 16  }
 0x26e   :  { %6106 = vsyncadd [#allocation5], 4294967280 }
 0x26f   :  { %5608 = vsyncpa [#allocation4], 1 }
 0x270   :  { %5609 = vsyncpa [#allocation7], 1 }
 0x271   :  { %5610 = vsyncpa [#allocation5], 1 }

</bundles_post_ra>
